<compile_context>
chip_gen: v7x
topology: tpu7x:2x2x1
jax: 0.10.0
libtpu: 0.0.40
codegen_flags: <defaults>
</compile_context>

<pallas_src>
import functools

import jax
import jax.numpy as jnp
from jax.experimental import pallas as pl
from jax.experimental.pallas import tpu as pltpu


def _gated_fusion_kernel(x_ref, y_ref, wx_ref, bx_ref, wy_ref, by_ref,
                         wo_ref, bo_ref, outx_ref, outy_ref, out_ref,
                         *, x_gate: bool):
    # fc_x / fc_y : bf16 operands, f32 accumulation, f32 bias add.
    out_x = jnp.dot(x_ref[...], wx_ref[...],
                    preferred_element_type=jnp.float32) + bx_ref[...]
    out_y = jnp.dot(y_ref[...], wy_ref[...],
                    preferred_element_type=jnp.float32) + by_ref[...]

    # Gate + elementwise multiply in f32 (EUP sigmoid, VPU mul).
    if x_gate:
        fused = jax.nn.sigmoid(out_x) * out_y
    else:
        fused = out_x * jax.nn.sigmoid(out_y)

    # fc_out : cast the fused activation to bf16 for the MXU, accumulate in f32.
    out = jnp.dot(fused.astype(wo_ref.dtype), wo_ref[...],
                  preferred_element_type=jnp.float32) + bo_ref[...]

    outx_ref[...] = out_x.astype(outx_ref.dtype)
    outy_ref[...] = out_y.astype(outy_ref.dtype)
    out_ref[...] = out.astype(out_ref.dtype)


def _round_up(v, m):
    return ((v + m - 1) // m) * m


def _pad2d(a, rows, cols):
    pr, pc = rows - a.shape[0], cols - a.shape[1]
    if pr or pc:
        a = jnp.pad(a, ((0, pr), (0, pc)))
    return a


def gated_fusion(x, y, wx, bx, wy, by, wo, bo, *, x_gate=True,
                 block_m=256, vmem_limit_bytes=48 * 1024 * 1024):
    """out_x, out_y, output = GatedFusion(x, y).

    x: (B, Din_x), y: (B, Din_y)
    wx: (Din_x, D), wy: (Din_y, D), wo: (D, Dout); biases (D,)/(1,D)/(Dout,)/(1,Dout).
    """
    B, dx = x.shape
    dy = y.shape[1]
    d = wx.shape[1]
    dout = wo.shape[1]

    LANE, SUBLANE = 128, 8

    # Lane-dense (multiple-of-128) feature dims; sublane-aligned batch tile.
    dxp = _round_up(dx, LANE)
    dyp = _round_up(dy, LANE)
    dp = _round_up(d, LANE)
    doutp = _round_up(dout, LANE)

    tm = min(block_m, _round_up(B, SUBLANE))
    bp = _round_up(B, tm)
    grid = (bp // tm,)

    # bf16 MXU operands; biases kept f32 for the f32 bias-add path.
    xp = _pad2d(x, bp, dxp).astype(jnp.bfloat16)
    yp = _pad2d(y, bp, dyp).astype(jnp.bfloat16)
    wxp = _pad2d(wx, dxp, dp).astype(jnp.bfloat16)
    wyp = _pad2d(wy, dyp, dp).astype(jnp.bfloat16)
    wop = _pad2d(wo, dp, doutp).astype(jnp.bfloat16)
    bxp = _pad2d(jnp.asarray(bx, jnp.float32).reshape(1, -1), 1, dp)
    byp = _pad2d(jnp.asarray(by, jnp.float32).reshape(1, -1), 1, dp)
    bop = _pad2d(jnp.asarray(bo, jnp.float32).reshape(1, -1), 1, doutp)

    # Batch-tiled operands move per grid step; weights/biases stay VMEM-resident.
    tiled = lambda cols: pl.BlockSpec((tm, cols), lambda i: (i, 0))
    resident = lambda shape: pl.BlockSpec(shape, lambda i: (0, 0))

    flops = 2 * bp * (dxp * dp + dyp * dp + dp * doutp)
    bytes_accessed = (
        (xp.size + yp.size + wxp.size + wyp.size + wop.size) * 2    # bf16 reads
        + (bxp.size + byp.size + bop.size) * 4                      # f32 bias reads
        + (2 * bp * dp + bp * doutp) * 4                            # f32 writes
    )
    cost = pl.CostEstimate(flops=flops, transcendentals=bp * dp,
                           bytes_accessed=bytes_accessed)

    out_x, out_y, out = pl.pallas_call(
        functools.partial(_gated_fusion_kernel, x_gate=x_gate),
        out_shape=(
            jax.ShapeDtypeStruct((bp, dp), jnp.float32),      # out_x
            jax.ShapeDtypeStruct((bp, dp), jnp.float32),      # out_y
            jax.ShapeDtypeStruct((bp, doutp), jnp.float32),   # output
        ),
        grid=grid,
        in_specs=[
            tiled(dxp), tiled(dyp),
            resident((dxp, dp)), resident((1, dp)),
            resident((dyp, dp)), resident((1, dp)),
            resident((dp, doutp)), resident((1, doutp)),
        ],
        out_specs=(tiled(dp), tiled(dp), tiled(doutp)),
        compiler_params=pltpu.CompilerParams(
            dimension_semantics=("parallel",),
            vmem_limit_bytes=vmem_limit_bytes,
        ),
        cost_estimate=cost,
    )(xp, yp, wxp, bxp, wyp, byp, wop, bop)

    # Slice the padding back off.
    return out_x[:B, :d], out_y[:B, :d], out[:B, :dout]


def _init_linear(key, in_dim, out_dim):
    # Deterministic PyTorch-Linear-style init: U(-1/sqrt(in), 1/sqrt(in)).
    kw, kb = jax.random.split(key)
    bound = 1.0 / (in_dim ** 0.5)
    w = jax.random.uniform(kw, (in_dim, out_dim), jnp.float32, -bound, bound)
    b = jax.random.uniform(kb, (1, out_dim), jnp.float32, -bound, bound)
    return w, b


if __name__ == "__main__":
    # Small shapes consistent with the module's forward; deliberately
    # non-multiples of 128 / the batch tile to exercise the padding path.
    B, input_dim_x, input_dim_y, dim, output_dim = 384, 160, 96, 128, 100

    root = jax.random.PRNGKey(0)
    kx, ky, k1, k2, k3 = jax.random.split(root, 5)

    x = jax.random.normal(kx, (B, input_dim_x), jnp.float32)
    y = jax.random.normal(ky, (B, input_dim_y), jnp.float32)

    wx, bx = _init_linear(k1, input_dim_x, dim)
    wy, by = _init_linear(k2, input_dim_y, dim)
    wo, bo = _init_linear(k3, dim, output_dim)

    # Pure-JAX f32 references (module semantics).
    ref_out_x = x @ wx + bx
    ref_out_y = y @ wy + by
    ref_out_true = (jax.nn.sigmoid(ref_out_x) * ref_out_y) @ wo + bo   # x_gate=True
    ref_out_false = (ref_out_x * jax.nn.sigmoid(ref_out_y)) @ wo + bo  # x_gate=False

    ok = True
    for x_gate, ref_output in ((True, ref_out_true), (False, ref_out_false)):
        out_x, out_y, output = gated_fusion(x, y, wx, bx, wy, by, wo, bo,
                                            x_gate=x_gate)
        jax.block_until_ready((out_x, out_y, output))
        # bf16 MXU operands -> loosened tolerance vs f32 reference.
        ok &= bool(jnp.allclose(out_x, ref_out_x, atol=2e-2, rtol=2e-2))
        ok &= bool(jnp.allclose(out_y, ref_out_y, atol=2e-2, rtol=2e-2))
        ok &= bool(jnp.allclose(output, ref_output, atol=2e-2, rtol=2e-2))

    assert ok, "Pallas GatedFusion does not match the JAX reference"
    print("KERNEL_OK")
</pallas_src>

<mosaic_0001>
module attributes {stable_mosaic.version = 11 : i64} {
  func.func @_gated_fusion_kernel(%arg0: i32, %arg1: memref<256x256xbf16, #tpu.memory_space<vmem>>, %arg2: memref<256x128xbf16, #tpu.memory_space<vmem>>, %arg3: memref<256x128xbf16, #tpu.memory_space<vmem>>, %arg4: memref<1x128xf32, #tpu.memory_space<vmem>>, %arg5: memref<128x128xbf16, #tpu.memory_space<vmem>>, %arg6: memref<1x128xf32, #tpu.memory_space<vmem>>, %arg7: memref<128x128xbf16, #tpu.memory_space<vmem>>, %arg8: memref<1x128xf32, #tpu.memory_space<vmem>>, %arg9: memref<256x128xf32, #tpu.memory_space<vmem>>, %arg10: memref<256x128xf32, #tpu.memory_space<vmem>>, %arg11: memref<256x128xf32, #tpu.memory_space<vmem>>) attributes {dimension_semantics = [#tpu.dimension_semantics<parallel>], iteration_bounds = array<i64: 2>, scalar_prefetch = 0 : i64, scratch_operands = 0 : i64, tpu.core_type = #tpu.core_type<tc>, window_params = [{transform_indices = @transform_0, window_bounds = array<i64: 256, 256>}, {transform_indices = @transform_1, window_bounds = array<i64: 256, 128>}, {pipeline_mode = #tpu.pipeline_mode<synchronous>, transform_indices = @transform_2, window_bounds = array<i64: 256, 128>}, {pipeline_mode = #tpu.pipeline_mode<synchronous>, transform_indices = @transform_3, window_bounds = array<i64: 1, 128>}, {pipeline_mode = #tpu.pipeline_mode<synchronous>, transform_indices = @transform_4, window_bounds = array<i64: 128, 128>}, {pipeline_mode = #tpu.pipeline_mode<synchronous>, transform_indices = @transform_5, window_bounds = array<i64: 1, 128>}, {pipeline_mode = #tpu.pipeline_mode<synchronous>, transform_indices = @transform_6, window_bounds = array<i64: 128, 128>}, {pipeline_mode = #tpu.pipeline_mode<synchronous>, transform_indices = @transform_7, window_bounds = array<i64: 1, 128>}, {transform_indices = @transform_8, window_bounds = array<i64: 256, 128>}, {transform_indices = @transform_9, window_bounds = array<i64: 256, 128>}, {transform_indices = @transform_10, window_bounds = array<i64: 256, 128>}]} {
    %c0 = arith.constant 0 : index
    %c0_0 = arith.constant 0 : index
    %0 = vector.load %arg1[%c0, %c0_0] : memref<256x256xbf16, #tpu.memory_space<vmem>>, vector<256x256xbf16>
    %c0_1 = arith.constant 0 : index
    %c0_2 = arith.constant 0 : index
    %1 = vector.load %arg3[%c0_1, %c0_2] : memref<256x128xbf16, #tpu.memory_space<vmem>>, vector<256x128xbf16>
    %cst = arith.constant dense<0.000000e+00> : vector<256x128xf32>
    %2 = tpu.matmul %0, %1, %cst {dimension_numbers = #tpu.dot_dimension_numbers<[1], [0], [0], [1], [0, 0, 1, 1], [], []>} : vector<256x256xbf16>, vector<256x128xbf16>, vector<256x128xf32> -> vector<256x128xf32>
    %c0_3 = arith.constant 0 : index
    %c0_4 = arith.constant 0 : index
    %3 = vector.load %arg4[%c0_3, %c0_4] : memref<1x128xf32, #tpu.memory_space<vmem>>, vector<1x128xf32>
    %4 = vector.broadcast %3 : vector<1x128xf32> to vector<256x128xf32>
    %5 = arith.addf %2, %4 : vector<256x128xf32>
    %c0_5 = arith.constant 0 : index
    %c0_6 = arith.constant 0 : index
    %6 = vector.load %arg2[%c0_5, %c0_6] : memref<256x128xbf16, #tpu.memory_space<vmem>>, vector<256x128xbf16>
    %c0_7 = arith.constant 0 : index
    %c0_8 = arith.constant 0 : index
    %7 = vector.load %arg5[%c0_7, %c0_8] : memref<128x128xbf16, #tpu.memory_space<vmem>>, vector<128x128xbf16>
    %cst_9 = arith.constant dense<0.000000e+00> : vector<256x128xf32>
    %8 = tpu.matmul %6, %7, %cst_9 {dimension_numbers = #tpu.dot_dimension_numbers<[1], [0], [0], [1], [0, 0, 1, 1], [], []>} : vector<256x128xbf16>, vector<128x128xbf16>, vector<256x128xf32> -> vector<256x128xf32>
    %c0_10 = arith.constant 0 : index
    %c0_11 = arith.constant 0 : index
    %9 = vector.load %arg6[%c0_10, %c0_11] : memref<1x128xf32, #tpu.memory_space<vmem>>, vector<1x128xf32>
    %10 = vector.broadcast %9 : vector<1x128xf32> to vector<256x128xf32>
    %11 = arith.addf %8, %10 : vector<256x128xf32>
    %12 = arith.negf %5 : vector<256x128xf32>
    %13 = math.exp %12 : vector<256x128xf32>
    %cst_12 = arith.constant 1.000000e+00 : f32
    %14 = vector.broadcast %cst_12 : f32 to vector<256x128xf32>
    %15 = arith.addf %14, %13 : vector<256x128xf32>
    %16 = arith.divf %14, %15 : vector<256x128xf32>
    %17 = arith.mulf %16, %11 : vector<256x128xf32>
    %18 = arith.truncf %17 : vector<256x128xf32> to vector<256x128xbf16>
    %c0_13 = arith.constant 0 : index
    %c0_14 = arith.constant 0 : index
    %19 = vector.load %arg7[%c0_13, %c0_14] : memref<128x128xbf16, #tpu.memory_space<vmem>>, vector<128x128xbf16>
    %cst_15 = arith.constant dense<0.000000e+00> : vector<256x128xf32>
    %20 = tpu.matmul %18, %19, %cst_15 {dimension_numbers = #tpu.dot_dimension_numbers<[1], [0], [0], [1], [0, 0, 1, 1], [], []>} : vector<256x128xbf16>, vector<128x128xbf16>, vector<256x128xf32> -> vector<256x128xf32>
    %c0_16 = arith.constant 0 : index
    %c0_17 = arith.constant 0 : index
    %21 = vector.load %arg8[%c0_16, %c0_17] : memref<1x128xf32, #tpu.memory_space<vmem>>, vector<1x128xf32>
    %22 = vector.broadcast %21 : vector<1x128xf32> to vector<256x128xf32>
    %23 = arith.addf %20, %22 : vector<256x128xf32>
    %c0_18 = arith.constant 0 : index
    %c0_19 = arith.constant 0 : index
    %24 = vector.load %arg9[%c0_18, %c0_19] : memref<256x128xf32, #tpu.memory_space<vmem>>, vector<256x128xf32>
    tpu.vector_store %arg9[%c0_18, %c0_19], %5 {strides = array<i32>} : memref<256x128xf32, #tpu.memory_space<vmem>>, vector<256x128xf32>,
    %c0_20 = arith.constant 0 : index
    %c0_21 = arith.constant 0 : index
    %25 = vector.load %arg10[%c0_20, %c0_21] : memref<256x128xf32, #tpu.memory_space<vmem>>, vector<256x128xf32>
    tpu.vector_store %arg10[%c0_20, %c0_21], %11 {strides = array<i32>} : memref<256x128xf32, #tpu.memory_space<vmem>>, vector<256x128xf32>,
    %c0_22 = arith.constant 0 : index
    %c0_23 = arith.constant 0 : index
    %26 = vector.load %arg11[%c0_22, %c0_23] : memref<256x128xf32, #tpu.memory_space<vmem>>, vector<256x128xf32>
    tpu.vector_store %arg11[%c0_22, %c0_23], %23 {strides = array<i32>} : memref<256x128xf32, #tpu.memory_space<vmem>>, vector<256x128xf32>,
    return
  }
  func.func @transform_0(%arg0: i32) -> (i32, i32) {
    %c0_i32 = arith.constant 0 : i32
    %c0_i32_0 = arith.constant 0 : i32
    return %arg0, %c0_i32 : i32, i32
  }
  func.func @transform_1(%arg0: i32) -> (i32, i32) {
    %c0_i32 = arith.constant 0 : i32
    %c0_i32_0 = arith.constant 0 : i32
    return %arg0, %c0_i32 : i32, i32
  }
  func.func @transform_2(%arg0: i32) -> (i32, i32) {
    %c0_i32 = arith.constant 0 : i32
    %c0_i32_0 = arith.constant 0 : i32
    %c0_i32_1 = arith.constant 0 : i32
    return %c0_i32, %c0_i32_0 : i32, i32
  }
  func.func @transform_3(%arg0: i32) -> (i32, i32) {
    %c0_i32 = arith.constant 0 : i32
    %c0_i32_0 = arith.constant 0 : i32
    %c0_i32_1 = arith.constant 0 : i32
    return %c0_i32, %c0_i32_0 : i32, i32
  }
  func.func @transform_4(%arg0: i32) -> (i32, i32) {
    %c0_i32 = arith.constant 0 : i32
    %c0_i32_0 = arith.constant 0 : i32
    %c0_i32_1 = arith.constant 0 : i32
    return %c0_i32, %c0_i32_0 : i32, i32
  }
  func.func @transform_5(%arg0: i32) -> (i32, i32) {
    %c0_i32 = arith.constant 0 : i32
    %c0_i32_0 = arith.constant 0 : i32
    %c0_i32_1 = arith.constant 0 : i32
    return %c0_i32, %c0_i32_0 : i32, i32
  }
  func.func @transform_6(%arg0: i32) -> (i32, i32) {
    %c0_i32 = arith.constant 0 : i32
    %c0_i32_0 = arith.constant 0 : i32
    %c0_i32_1 = arith.constant 0 : i32
    return %c0_i32, %c0_i32_0 : i32, i32
  }
  func.func @transform_7(%arg0: i32) -> (i32, i32) {
    %c0_i32 = arith.constant 0 : i32
    %c0_i32_0 = arith.constant 0 : i32
    %c0_i32_1 = arith.constant 0 : i32
    return %c0_i32, %c0_i32_0 : i32, i32
  }
  func.func @transform_8(%arg0: i32) -> (i32, i32) {
    %c0_i32 = arith.constant 0 : i32
    %c0_i32_0 = arith.constant 0 : i32
    return %arg0, %c0_i32 : i32, i32
  }
  func.func @transform_9(%arg0: i32) -> (i32, i32) {
    %c0_i32 = arith.constant 0 : i32
    %c0_i32_0 = arith.constant 0 : i32
    return %arg0, %c0_i32 : i32, i32
  }
  func.func @transform_10(%arg0: i32) -> (i32, i32) {
    %c0_i32 = arith.constant 0 : i32
    %c0_i32_0 = arith.constant 0 : i32
    return %arg0, %c0_i32 : i32, i32
  }
}

</mosaic_0001>

<bundles_post_ra>
// kernel: tpu_custom_call.1
= control target key start
LH: loop header
LB: loop body
LE: loop exit
PB: predicated region body
PF: predicated region fallthrough
CT: control target
= control target key end

     0   :  { %s4020_s0 = inlined_call_operand.hbm [shape: bf16[512,256], index: 0, kind: input, shape index: {}]   ;;  %s4021_s1 = inlined_call_operand.hbm [shape: bf16[512,128], index: 1, kind: input, shape index: {}]   ;;  %s4022_s2 = inlined_call_operand.hbm [shape: bf16[256,128], index: 2, kind: input, shape index: {}]   ;;  %s4023_s3 = inlined_call_operand.vmem [shape: f32[1,128], index: 3, kind: input, shape index: {}]   ;;  %s4024_s4 = inlined_call_operand.hbm [shape: bf16[128,128], index: 4, kind: input, shape index: {}]   ;;  %s4025_s5 = inlined_call_operand.vmem [shape: f32[1,128], index: 5, kind: input, shape index: {}]   ;;  %s4026_s6 = inlined_call_operand.hbm [shape: bf16[128,128], index: 6, kind: input, shape index: {}]   ;;  %s4027_s7 = inlined_call_operand.vmem [shape: f32[1,128], index: 7, kind: input, shape index: {}]   ;;  %s4028_s8 = inlined_call_operand.hbm [shape: f32[512,128], index: 8, kind: output, shape index: {0}]   ;;  %s4029_s9 = inlined_call_operand.hbm [shape: f32[512,128], index: 9, kind: output, shape index: {1}]   ;;  %s4030_s10 = inlined_call_operand.hbm [shape: f32[512,128], index: 10, kind: output, shape index: {2}]  }
   0x1   :  { %4040 = sst [smem:[#allocation23_spill]] %s4020_s0 }
   0x2   :  { %4041 = sst [smem:[#allocation24_spill]] %s4022_s2 }
   0x3   :  { %4042 = sst [smem:[#allocation25_spill]] %s4024_s4 }
   0x4   :  { %4043 = sst [smem:[#allocation26_spill]] %s4026_s6 }
   0x5   :  { %4044 = sst [smem:[#allocation27_spill]] %s4027_s7 }
   0x6   :  { %4045 = sst [smem:[#allocation28_spill]] %s4030_s10 }
   0x7   :  { %16 = vsyncpa [#allocation3], 0 }
   0x8   :  { %18 = vsyncpa [#allocation3 + $0x1], 0 }
   0x9   :  { %19 = vsyncpa [#allocation6], 0 }
   0xa   :  { %21 = vsyncpa [#allocation6 + $0x1], 0 }
   0xb   :  { %22 = vsyncpa [#allocation9], 0 }
   0xc   :  { %23 = vsyncpa [#allocation4], 0 }
   0xd   :  { %25 = vsyncpa [#allocation4 + $0x1], 0 }
   0xe   :  { %26 = vsyncpa [#allocation13], 0 }
   0xf   :  { %28 = vsyncpa [#allocation13 + $0x1], 0  ;;  %s3228_s13 = smov 0   ;;  %s3230_s14 = smov 0  }
  0x10   :  { %s3232_s15 = smov 0   ;;  %s3234_s16 = smov 0  }
  0x11 LB: > { %4046 = sst [smem:[#allocation21_spill]] %s3145_s13  ;;  %s3249_s17 = sadd.s32 4294967295, %s3157_s16   ;;  %s3157_s16 = sphi %s3234_s16, %s4079_s16   ;;  %s3153_s15 = sphi %s3232_s15, %s4078_s15   ;;  %s3149_s14 = sphi %s3230_s14, %s4077_s14   ;;  %s3145_s13 = sphi %s3228_s13, %s4076_s13  }
  0x12   : > { %s4031_s18 = sadd.s32 4294967294, %s3157_s16   ;;  %p54_p0 = scmp.ne.s32.totalorder %s3149_s14, %s3145_s13 }
  0x13   : > { %p4032_p1 = scmp.eq.s32.totalorder %s3249_s17, 0  ;;  %p236_p3 = scmp.eq.s32.totalorder %s4031_s18, 1 }
  0x14   : > { %p2144_p5 = scmp.ge.s32.totalorder %s3157_s16, 1  ;;  %p295_p7 = scmp.lt.s32.totalorder %s3157_s16, 3 }
  0x15   : > { %p3260_p4 = por %p4032_p1, %p54_p0  ;;  %p3265_p6 = por %p236_p3, %p54_p0 }
  0x16   : > { %p3270_p8 = pnand %p2144_p5, %p295_p7  ;;  %s3159_s22 = smov [#allocation7]  }
  0x17   : > { %s4047_s19 = scalar_select %p3260_p4, 1, 0 }
  0x18   : > { %s4048_s20 = scalar_select %p3265_p6, 1, 0 }
  0x19   : > { %s4050_s21 = scalar_select %p3270_p8, 1, 0 }
  0x1a   : > { %4049 = sst [smem:[#allocation22_spill]] %s4048_s20  ;;  %s307_s23 = sshll.u32 %s3159_s22, 4  ;;  %s3274_s23 = int_to_ptr.vmem [resolvable:$true] %s307_s23 }
  0x1b   : > { %p2575_p9 = pneg %p3270_p8  ;;  %s3160_s25 = smov [#allocation8]  }
  0x1c   : > { %s323_s26 = sshll.u32 %s3160_s25, 4  ;;  %s3161_s27 = smov [#allocation10]   ;;  %s3285_s26 = int_to_ptr.vmem [resolvable:$true] %s323_s26 }
  0x1d   : > { %p3281_p11 = pnand %p2575_p9, %p4032_p1  ;;  %s3287_s28 = sshll.u32 %s3161_s27, 4  ;;  %s340_s28 = int_to_ptr.vmem [resolvable:$true] %s3287_s28 }
  0x1e   : > { %s4052_s2 = sld [smem:[#allocation24_spill]] }
  0x1f   : > { %p3297_p13 = pneg %p3281_p11 }
  0x24   : > { %s2875_s11 = scalar_lea.hbm %s4052_s2, 2048 }
  0x25   : > { %p2876_p12 = scmp.ne.s32.totalorder %s4052_s2, %s2875_s11  ;;  %p2882_p5 = scmp.lt.u32.totalorder %s2875_s11, %s4052_s2 }
  0x27   : > { %p2878_p0 = pnand %p3297_p13, %p2876_p12 }
  0x29   : > { %p2879_p3 = pneg %p2878_p0 }
  0x2b   : > { %p2884_p7 = pnand %p2882_p5, %p2879_p3 }
  0x2d   : > { %2887 = shalt.err (!%p2884_p7)
}
  0x2e   : > { %s2888_s29 = scalar_lea.vmem %s3274_s23, 2048  ;;  %p2896_p2 = scmp.lt.s32.totalorder %s3274_s23, %s3274_s23 }
  0x2f   : > { %p2889_p9 = scmp.ne.s32.totalorder %s3274_s23, %s2888_s29  ;;  %p2897_p6 = scmp.lt.s32.totalorder %s2888_s29, %s2888_s29 }
  0x31   : > { %p2891_p10 = pnand %p2889_p9, %p3297_p13  ;;  %p2898_p12 = por %p2897_p6, %p2896_p2 }
  0x33   : > { %p2892_p1 = pneg %p2891_p10 }
  0x35   : > { %p2899_p0 = pnand %p2898_p12, %p2892_p1 }
  0x37   : > { %2902 = shalt.err (!%p2899_p0)
}
  0x38   : > { %s4038_s30 = smov 64   ;;  %s4039_s11 = smov 4  }
  0x39   : > { %2578 = dma.hbm_to_vmem [thread:$0]  (!%p3281_p11), %s4052_s2, 2048, %s3274_s23, [#allocation6], %s4038_s30, %s4038_s30, %s4039_s11  }
  0x3a   : > { %s4054_s4 = sld [smem:[#allocation25_spill]] }
  0x40   : > { %s2903_s29 = scalar_lea.hbm %s4054_s4, 1024 }
  0x41   : > { %p2904_p1 = scmp.ne.s32.totalorder %s4054_s4, %s2903_s29  ;;  %p2910_p10 = scmp.lt.u32.totalorder %s2903_s29, %s4054_s4 }
  0x43   : > { %p2906_p2 = pnand %p2904_p1, %p3297_p13 }
  0x45   : > { %p2907_p6 = pneg %p2906_p2 }
  0x47   : > { %p2912_p3 = pnand %p2910_p10, %p2907_p6 }
  0x49   : > { %2915 = shalt.err (!%p2912_p3)
}
  0x4a   : > { %s2916_s23 = scalar_lea.vmem %s3285_s26, 1024  ;;  %p2924_p12 = scmp.lt.s32.totalorder %s3285_s26, %s3285_s26 }
  0x4b   : > { %p2917_p5 = scmp.ne.s32.totalorder %s3285_s26, %s2916_s23  ;;  %p2925_p0 = scmp.lt.s32.totalorder %s2916_s23, %s2916_s23 }
  0x4d   : > { %p2919_p7 = pnand %p2917_p5, %p3297_p13  ;;  %p2926_p1 = por %p2925_p0, %p2924_p12 }
  0x4f   : > { %p2920_p9 = pneg %p2919_p7 }
  0x51   : > { %p2927_p2 = pnand %p2926_p1, %p2920_p9 }
  0x53   : > { %2930 = shalt.err (!%p2927_p2)
}
  0x54   : > { %2581 = dma.hbm_to_vmem [thread:$0]  (!%p3281_p11), %s4054_s4, 1024, %s3285_s26, [#allocation9], %s4038_s30, %s4038_s30, %s4039_s11  }
  0x55   : > { %s4055_s6 = sld [smem:[#allocation26_spill]] }
  0x5b   : > { %s2931_s12 = scalar_lea.hbm %s4055_s6, 1024 }
  0x5c   : > { %p2932_p6 = scmp.ne.s32.totalorder %s4055_s6, %s2931_s12  ;;  %p2938_p5 = scmp.lt.u32.totalorder %s2931_s12, %s4055_s6 }
  0x5e   : > { %p2934_p10 = pnand %p2932_p6, %p3297_p13 }
  0x60   : > { %p2935_p3 = pneg %p2934_p10 }
  0x62   : > { %p2940_p7 = pnand %p2938_p5, %p2935_p3 }
  0x64   : > { %2943 = shalt.err (!%p2940_p7)
}
  0x65   : > { %s2944_s23 = scalar_lea.vmem %s340_s28, 1024  ;;  %p2952_p1 = scmp.lt.s32.totalorder %s340_s28, %s340_s28 }
  0x66   : > { %p2945_p9 = scmp.ne.s32.totalorder %s340_s28, %s2944_s23  ;;  %p2953_p2 = scmp.lt.s32.totalorder %s2944_s23, %s2944_s23 }
  0x68   : > { %p2947_p12 = pnand %p2945_p9, %p3297_p13  ;;  %p2954_p4 = por %p2953_p2, %p2952_p1 }
  0x6a   : > { %p2948_p0 = pneg %p2947_p12 }
  0x6c   : > { %p2955_p8 = pnand %p2954_p4, %p2948_p0 }
  0x6e   : > { %2958 = shalt.err (!%p2955_p8)
}
  0x6f   : > { %2584 = dma.hbm_to_vmem [thread:$0]  (!%p3281_p11), %s4055_s6, 1024, %s340_s28, [#allocation9], %s4038_s30, %s4038_s30, %s4039_s11  }
  0x70   : > { %s3370_s18 = sadd.s32 1, %s3157_s16   ;;  %s41_s10 = sadd.s32 1, %s3153_s15 }
  0x71   : > { %s38_s24 = ssub.s32 %s3157_s16, %s3370_s18  ;;  %p48_p8 = scmp.ne.s32.totalorder %s3153_s15, %s3149_s14 }
  0x72   : > { %p39_p4 = scmp.eq.s32.totalorder %s38_s24, 0  ;;  %p49_p13 = scmp.eq.s32.totalorder %s3157_s16, 0 }
  0x73   : > { %p2605_p6 = scmp.lt.s32.totalorder %s3157_s16, 2  ;;  %p4056_p3 = scmp.eq.s32.totalorder %s3249_s17, 1 }
  0x74   : > { %s3380_s13 = scalar_select %p39_p4, %s3153_s15, %s41_s10  }
  0x75   : > { %p50_p10 = por %p49_p13, %p48_p8  ;;  %p3384_p5 = por %p4056_p3, %p48_p8 }
  0x76   : > { %s3389_s12 = sand.u32 1, %s3153_s15   ;;  %s2292_s28 = sshll.u32 %s3157_s16, 12 }
  0x77   : > { %s2149_s22 = sshll.u32 %s3389_s12, 8  ;;  %s4058_s0 = sld [smem:[#allocation23_spill]] }
  0x78   : > { %s360_s23 = scalar_lea.vmem [#allocation2], %s2149_s22  ;;  %p3398_p11 = pnand %p2605_p6, %p50_p10 }
  0x79   : > { %s368_s26 = sshll.u32 %s360_s23, 4  ;;  %s357_s24 = scalar_lea.sflag [#allocation3], %s3389_s12  ;;  %s3402_s26 = int_to_ptr.vmem [resolvable:$true] %s368_s26 }
  0x7a   : > { %p2961_p9 = pneg %p3398_p11 }
  0x7d   : > { %s3396_s29 = scalar_lea.hbm %s4058_s0, %s2292_s28  ;;  %s2964_s25 = scalar_lea.hbm %s4058_s0, 8192 }
  0x7e   : > { %s2959_s10 = scalar_lea.hbm %s3396_s29, 4096  ;;  %p2965_p1 = scmp.lt.u32.totalorder %s3396_s29, %s4058_s0 }
  0x7f   : > { %p2960_p7 = scmp.ne.s32.totalorder %s3396_s29, %s2959_s10  ;;  %p2966_p2 = scmp.lt.u32.totalorder %s2964_s25, %s2959_s10 }
  0x80   : > { %p2968_p8 = scmp.lt.u32.totalorder %s2959_s10, %s3396_s29 }
  0x81   : > { %p2962_p12 = pnand %p2961_p9, %p2960_p7  ;;  %p2967_p4 = por %p2966_p2, %p2965_p1 }
  0x83   : > { %p2963_p0 = pneg %p2962_p12  ;;  %p2969_p13 = por %p2968_p8, %p2967_p4 }
  0x85   : > { %p2970_p6 = pnand %p2969_p13, %p2963_p0 }
  0x87   : > { %2973 = shalt.err (!%p2970_p6)
}
  0x88   : > { %s2974_s30 = scalar_lea.vmem %s3402_s26, 4096  ;;  %s3164_s28 = smov [#allocation2]  }
  0x89   : > { %p2975_p10 = scmp.ne.s32.totalorder %s3402_s26, %s2974_s30  ;;  %s2979_s22 = sshll.u32 %s3164_s28, 4  ;;  %s2980_s22 = int_to_ptr.vmem [resolvable:$false] %s2979_s22 }
  0x8a   : > { %s2981_s27 = scalar_lea.vmem %s2980_s22, 8192  ;;  %p2982_p12 = scmp.lt.s32.totalorder %s3402_s26, %s2980_s22 }
  0x8b   : > { %p2977_p3 = pnand %p2975_p10, %p2961_p9  ;;  %p2983_p1 = scmp.lt.s32.totalorder %s2981_s27, %s2974_s30 }
  0x8d   : > { %p2978_p7 = pneg %p2977_p3  ;;  %p2984_p2 = por %p2983_p1, %p2982_p12 }
  0x8f   : > { %p2985_p4 = pnand %p2984_p2, %p2978_p7 }
  0x91   : > { %2988 = shalt.err (!%p2985_p4)
}
  0x92   : > { %s3165_s10 = smov 128   ;;  %s3166_s25 = smov 8  }
  0x93   : > { %2588 = dma.hbm_to_vmem [thread:$0]  (!%p3398_p11), %s3396_s29, 4096, %s3402_s26, %s357_s24, %s3165_s10, %s3165_s10, %s3166_s25  }
  0x94   : > { %s378_s23 = sand.u32 1, %s3157_s16   ;;  %s2153_s28 = sshll.u32 %s3389_s12, 7 }
  0x95   : > { %s2293_s22 = sshll.u32 %s3157_s16, 11  ;;  %s382_s30 = scalar_lea.vmem [#allocation5], %s2153_s28 }
  0x96   : > { %s389_s27 = sshll.u32 %s382_s30, 4  ;;  %s3438_s2 = scalar_lea.hbm %s4021_s1, %s2293_s22  ;;  %s3440_s27 = int_to_ptr.vmem [resolvable:$true] %s389_s27 }
  0x97   : > { %s3442_s4 = scalar_lea.sflag [#allocation6], %s378_s23  ;;  %s2989_s6 = scalar_lea.hbm %s3438_s2, 2048 }
  0x98   : > { %p2990_p0 = scmp.ne.s32.totalorder %s3438_s2, %s2989_s6  ;;  %s2994_s0 = scalar_lea.hbm %s4021_s1, 4096 }
  0x99   : > { %p2995_p6 = scmp.lt.u32.totalorder %s3438_s2, %s4021_s1  ;;  %p2996_p10 = scmp.lt.u32.totalorder %s2994_s0, %s2989_s6 }
  0x9a   : > { %p2992_p8 = pnand %p2990_p0, %p2961_p9  ;;  %p2998_p7 = scmp.lt.u32.totalorder %s2989_s6, %s3438_s2 }
  0x9b   : > { %p2997_p3 = por %p2996_p10, %p2995_p6 }
  0x9c   : > { %p2993_p13 = pneg %p2992_p8 }
  0x9d   : > { %p2999_p12 = por %p2998_p7, %p2997_p3 }
  0x9f   : > { %p3000_p1 = pnand %p2999_p12, %p2993_p13 }
  0xa1   : > { %3003 = shalt.err (!%p3000_p1)
}
  0xa2   : > { %s3004_s24 = scalar_lea.vmem %s3440_s27, 2048  ;;  %s3167_s10 = smov [#allocation5]  }
  0xa3   : > { %p3005_p2 = scmp.ne.s32.totalorder %s3440_s27, %s3004_s24  ;;  %s3009_s25 = sshll.u32 %s3167_s10, 4  ;;  %s3010_s25 = int_to_ptr.vmem [resolvable:$false] %s3009_s25 }
  0xa4   : > { %s3011_s23 = scalar_lea.vmem %s3010_s25, 4096  ;;  %p3012_p8 = scmp.lt.s32.totalorder %s3440_s27, %s3010_s25 }
  0xa5   : > { %p3007_p4 = pnand %p3005_p2, %p2961_p9  ;;  %p3013_p6 = scmp.lt.s32.totalorder %s3011_s23, %s3004_s24 }
  0xa7   : > { %p3008_p0 = pneg %p3007_p4  ;;  %p3014_p10 = por %p3013_p6, %p3012_p8 }
  0xa9   : > { %p3015_p3 = pnand %p3014_p10, %p3008_p0 }
  0xab   : > { %3018 = shalt.err (!%p3015_p3)
}
  0xac   : > { %s4060_s6 = smov 4   ;;  %s4061_s28 = smov 64  }
  0xad   : > { %2591 = dma.hbm_to_vmem [thread:$0]  (!%p3398_p11), %s3438_s2, 2048, %s3440_s27, %s3442_s4, %s4061_s28, %s4061_s28, %s4060_s6  }
  0xae   : > { %p4062_p9 = scmp.ne.s32.totalorder %s4050_s21, 0 }
  0xaf   : > { %s3474_s22 = sand.u32 (!%p4062_p9), 1, %s3149_s14   ;;  %p4063_p13 = scmp.ne.s32.totalorder (!%p4062_p9), %s4047_s19, 0 }
  0xb0   : > { %401 = sbr.rel (%p4062_p9) target bundleno = 827 (0x33b), region = 52  ;;  %s3477_s30 = sshll.u32 (!%p4062_p9), %s3474_s22, 8 }
  0xb1   : > { %s404_s7 = scalar_lea.sflag (!%p4062_p9), [#allocation3], %s3474_s22  ;;  %s3481_s12 = scalar_lea.vmem (!%p4062_p9), [#allocation2], %s3477_s30 }
  0xb7   : > { %3120 = dma.done.wait (%p4063_p13), %s404_s7, 4096  }
  0xb8   : > { %3122 = vsyncadd (%p4063_p13), %s404_s7, 4294963200  ;;  %s412_s2 = sand.u32 1, %s3249_s17   ;;  %s2158_s4 = sshll.u32 %s3474_s22, 7 }
  0xb9   : > { %s413_s21 = scalar_lea.sflag [#allocation6], %s412_s2  ;;  %s3491_s27 = scalar_lea.vmem [#allocation5], %s2158_s4 }
  0xba   : > { %3124 = dma.done.wait (%p4063_p13), %s413_s21, 2048  }
  0xbb   : > { %3126 = vsyncadd (%p4063_p13), %s413_s21, 4294965248  ;;  %p4064_p11 = scmp.eq.s32.totalorder %s3249_s17, 0 }
  0xbd   : > { %3128 = dma.done.wait (%p4064_p11), [#allocation6], 2048   ;;  %p4065_p7 = pmov %p4064_p11 }
  0xbf   : > { %3130 = vsyncadd (%p4065_p7), [#allocation6], 4294965248  ;;  %p4066_p12 = pmov %p4065_p7 }
  0xc0   : > { %p4067_p1 = pmov %p4065_p7 }
  0xc1   : > { %3132 = dma.done.wait (%p4066_p12), [#allocation9], 2048  }
  0xc2   : > { %3134 = vsyncadd (%p4067_p1), [#allocation9], 4294965248  ;;  %v2651_v0 = vld [vmem:[#allocation7 + $0x40] sm:$0xff]   ;;  %v2653_v2 = vld [vmem:[#allocation7 + $0x48] sm:$0xff]   ;;  %s3560_s0 = scalar_lea.vmem [#allocation11], %s3477_s30  ;;  %s3579_s24 = scalar_lea.vmem [#allocation12], %s3477_s30 }
  0xc3   : > { %v2652_v1 = vld [vmem:[#allocation7] sm:$0xff]   ;;  %2297 = vmatprep.subr.bf16.mxu0 %v2651_v0  ;;  %v2654_v3 = vld [vmem:[#allocation7 + $0x8] sm:$0xff]   ;;  %v2655_v4 = vld [vmem:[#allocation7 + $0x50] sm:$0xff]   ;;  %s3818_s10 = sshll.u32 %s3249_s17, 12  ;;  %s1942_s25 = sshll.u32 %s3579_s24, 4  ;;  %s3827_s25 = int_to_ptr.vmem [resolvable:$true] %s1942_s25 }
  0xc4   : > { %2298 = vmatpush3.bf16.msra.mxu0 %v2652_v1  ;;  %v2656_v5 = vld [vmem:[#allocation7 + $0x10] sm:$0xff]   ;;  %v2657_v6 = vld [vmem:[#allocation7 + $0x58] sm:$0xff]   ;;  %v2659_v8 = vld [vmem:[#allocation7 + $0x60] sm:$0xff]   ;;  %s3825_s28 = scalar_lea.hbm %s4029_s9, %s3818_s10  ;;  %s3831_s7 = scalar_lea.sflag [#allocation13], %s412_s2 }
  0xc5   : > { %2299 = vmatprep.subr.bf16.mxu0 %v2653_v2  ;;  %v2658_v7 = vld [vmem:[#allocation7 + $0x18] sm:$0xff]   ;;  %v2660_v9 = vld [vmem:[#allocation7 + $0x20] sm:$0xff]   ;;  %v2661_v11 = vld [vmem:[#allocation7 + $0x68] sm:$0xff]   ;;  %s3168_s4 = smov [#allocation12]  }
  0xc6   : > { %v2666_v10 = vld [vmem:[#allocation8] sm:$0xff]   ;;  %v2662_v12 = vld [vmem:[#allocation7 + $0x28] sm:$0xff]   ;;  %v2663_v13 = vld [vmem:[#allocation7 + $0x70] sm:$0xff]   ;;  %s3023_s21 = sshll.u32 %s3168_s4, 4  ;;  %s3024_s21 = int_to_ptr.vmem [resolvable:$false] %s3023_s21 }
  0xc7   : > { %2457 = vmatprep.subr.bf16.mxu1 %v2666_v10  ;;  %v2670_v14 = vld [vmem:[%s3481_s12 + $0x4] ss:$8 sps:$4 sm:$0xff]   ;;  %v2672_v16 = vld [vmem:[#allocation8 + $0x10] sm:$0xff]   ;;  %v2676_v18 = vld [vmem:[#allocation8 + $0x18] sm:$0xff]   ;;  %p3026_p8 = scmp.lt.s32.totalorder %s3827_s25, %s3024_s21 }
  0xc8   : > { %2300 = vmatpush3.bf16.msra.mxu0 %v2654_v3  ;;  %2458 = vmatpush3.bf16.msra.mxu1 %v2666_v10  ;;  %v2671_v15 = vld [vmem:[#allocation8 + $0x8] sm:$0xff]   ;;  %v2664_v17 = vld [vmem:[#allocation7 + $0x30] sm:$0xff]   ;;  %v2665_v19 = vld [vmem:[#allocation7 + $0x78] sm:$0xff]  }
  0xc9   : > { %2301 = vmatprep.subr.bf16.mxu0 %v2655_v4  ;;  %845 = vmatprep.mubr.bf16.mxu0 %v2670_v14  ;;  %v2667_v20 = vld [vmem:[#allocation7 + $0x38] sm:$0xff]   ;;  %v2677_v21 = vld [vmem:[#allocation8 + $0x20] sm:$0xff]   ;;  %v2681_v25 = vld [vmem:[#allocation8 + $0x28] sm:$0xff]  }
  0xca   : > { %2459 = vmatprep.subr.bf16.mxu1 %v2671_v15  ;;  %v2668_v22 = vld [vmem:[%s3481_s12] ss:$8 sps:$4 sm:$0xff]   ;;  %v2673_v23 = vld [vmem:[%s3481_s12 + $0x14] ss:$8 sps:$4 sm:$0xff]   ;;  %v2675_v27 = vld [vmem:[%s3481_s12 + $0x10] ss:$8 sps:$4 sm:$0xff]  }
  0xcb   : > { %v2687_v24 = vld [vmem:[%s3491_s27] sm:$0xff]   ;;  %v2682_v26 = vld [vmem:[#allocation8 + $0x30] sm:$0xff]   ;;  %v2686_v29 = vld [vmem:[#allocation8 + $0x38] sm:$0xff]  }
  0xcc   : > { %2302 = vmatpush3.bf16.msra.mxu0 %v2656_v5  ;;  %2460 = vmatpush3.bf16.msra.mxu1 %v2671_v15  ;;  %v2678_v28 = vld [vmem:[%s3481_s12 + $0x24] ss:$8 sps:$4 sm:$0xff]   ;;  %v2680_v31 = vld [vmem:[%s3481_s12 + $0x20] ss:$8 sps:$4 sm:$0xff]   ;;  %v2695_v32 = vld [vmem:[%s3491_s27 + $0x10] sm:$0xff]  }
  0xcd   : > { %2303 = vmatprep.subr.bf16.mxu0 %v2657_v6  ;;  %2461 = vmatprep.subr.bf16.mxu1 %v2672_v16  ;;  %v2688_v30 = vld [vmem:[%s3491_s27 + $0x8] sm:$0xff]   ;;  %v2683_v33 = vld [vmem:[%s3481_s12 + $0x34] ss:$8 sps:$4 sm:$0xff]   ;;  %v2685_v34 = vld [vmem:[%s3481_s12 + $0x30] ss:$8 sps:$4 sm:$0xff]  }
  0xce   : > { %2473 = vmatprep.mubr.bf16.mxu1 %v2687_v24  ;;  %v2696_v35 = vld [vmem:[%s3491_s27 + $0x18] sm:$0xff]   ;;  %v2703_v36 = vld [vmem:[%s3491_s27 + $0x20] sm:$0xff]   ;;  %v2704_v39 = vld [vmem:[%s3491_s27 + $0x28] sm:$0xff]  }
  0xcf   : > { %v2689_v37 = vld [vmem:[%s3481_s12 + $0x44] ss:$8 sps:$4 sm:$0xff]   ;;  %v2691_v38 = vld [vmem:[%s3481_s12 + $0x40] ss:$8 sps:$4 sm:$0xff]   ;;  %v2692_v40 = vld [vmem:[%s3481_s12 + $0x54] ss:$8 sps:$4 sm:$0xff]  }
  0xd0   : > { %2304 = vmatpush3.bf16.msra.mxu0 %v2658_v7  ;;  %2462 = vmatpush3.bf16.msra.mxu1 %v2672_v16  ;;  %v2711_v41 = vld [vmem:[%s3491_s27 + $0x30] sm:$0xff]   ;;  %v2712_v42 = vld [vmem:[%s3491_s27 + $0x38] sm:$0xff]   ;;  %v2719_v44 = vld [vmem:[%s3491_s27 + $0x40] sm:$0xff]  }
  0xd1   : > { %2305 = vmatprep.subr.bf16.mxu0 %v2659_v8  ;;  %2463 = vmatprep.subr.bf16.mxu1 %v2676_v18  ;;  %v2694_v43 = vld [vmem:[%s3481_s12 + $0x50] ss:$8 sps:$4 sm:$0xff]   ;;  %v2697_v45 = vld [vmem:[%s3481_s12 + $0x64] ss:$8 sps:$4 sm:$0xff]   ;;  %v2699_v47 = vld [vmem:[%s3481_s12 + $0x60] ss:$8 sps:$4 sm:$0xff]  }
  0xd2   : > { %v2720_v46 = vld [vmem:[%s3491_s27 + $0x48] sm:$0xff]   ;;  %v2727_v48 = vld [vmem:[%s3491_s27 + $0x50] sm:$0xff]   ;;  %v2728_v50 = vld [vmem:[%s3491_s27 + $0x58] sm:$0xff]  }
  0xd3   : > { %v2700_v49 = vld [vmem:[%s3481_s12 + $0x74] ss:$8 sps:$4 sm:$0xff]   ;;  %v2702_v51 = vld [vmem:[%s3481_s12 + $0x70] ss:$8 sps:$4 sm:$0xff]   ;;  %v2735_v52 = vld [vmem:[%s3491_s27 + $0x60] sm:$0xff]  }
  0xd4   : > { %2306 = vmatpush3.bf16.msra.mxu0 %v2660_v9  ;;  %2464 = vmatpush3.bf16.msra.mxu1 %v2676_v18  ;;  %v2705_v53 = vld [vmem:[%s3481_s12 + $0x84] ss:$8 sps:$4 sm:$0xff]   ;;  %v2707_v55 = vld [vmem:[%s3481_s12 + $0x80] ss:$8 sps:$4 sm:$0xff]   ;;  %v2737_v56 = vld [vmem:[%s3491_s27 + $0x70] sm:$0xff]  }
  0xd5   : > { %2307 = vmatprep.subr.bf16.mxu0 %v2661_v11  ;;  %2465 = vmatprep.subr.bf16.mxu1 %v2677_v21  ;;  %v2736_v54 = vld [vmem:[%s3491_s27 + $0x68] sm:$0xff]   ;;  %v2708_v57 = vld [vmem:[%s3481_s12 + $0x94] ss:$8 sps:$4 sm:$0xff]   ;;  %v2710_v59 = vld [vmem:[%s3481_s12 + $0x90] ss:$8 sps:$4 sm:$0xff]  }
  0xd6   : > { %v2738_v58 = vld [vmem:[%s3491_s27 + $0x78] sm:$0xff]   ;;  %v2713_v60 = vld [vmem:[%s3481_s12 + $0xa4] ss:$8 sps:$4 sm:$0xff]   ;;  %v2715_v61 = vld [vmem:[%s3481_s12 + $0xa0] ss:$8 sps:$4 sm:$0xff]   ;;  %s3025_s27 = scalar_lea.vmem %s3024_s21, 8192 }
  0xd7   : > { %v2716_v62 = vld [vmem:[%s3481_s12 + $0xb4] ss:$8 sps:$4 sm:$0xff]   ;;  %v2718_v63 = vld [vmem:[%s3481_s12 + $0xb0] ss:$8 sps:$4 sm:$0xff]   ;;  %v2721_v0 = vld [vmem:[%s3481_s12 + $0xc4] ss:$8 sps:$4 sm:$0xff]  }
  0xd8   : > { %2308 = vmatpush3.bf16.msra.mxu0 %v2662_v12  ;;  %2466 = vmatpush3.bf16.msra.mxu1 %v2677_v21  ;;  %v2723_v1 = vld [vmem:[%s3481_s12 + $0xc0] ss:$8 sps:$4 sm:$0xff]   ;;  %v2724_v2 = vld [vmem:[%s3481_s12 + $0xd4] ss:$8 sps:$4 sm:$0xff]   ;;  %v2726_v5 = vld [vmem:[%s3481_s12 + $0xd0] ss:$8 sps:$4 sm:$0xff]  }
  0xd9   : > { %2309 = vmatprep.subr.bf16.mxu0 %v2663_v13  ;;  %2467 = vmatprep.subr.bf16.mxu1 %v2681_v25  ;;  %v2739_v3 = vld [vmem:[#allocation10] sm:$0xff]   ;;  %v2740_v4 = vld [vmem:[#allocation10 + $0x8] sm:$0xff]   ;;  %v2741_v7 = vld [vmem:[#allocation10 + $0x10] sm:$0xff]  }
  0xda   : > { %v2729_v6 = vld [vmem:[%s3481_s12 + $0xe4] ss:$8 sps:$4 sm:$0xff]   ;;  %v2742_v8 = vld [vmem:[#allocation10 + $0x18] sm:$0xff]   ;;  %v2731_v9 = vld [vmem:[%s3481_s12 + $0xe0] ss:$8 sps:$4 sm:$0xff]  }
  0xdb   : > { %v2732_v10 = vld [vmem:[%s3481_s12 + $0xf4] ss:$8 sps:$4 sm:$0xff]   ;;  %v2743_v11 = vld [vmem:[#allocation10 + $0x20] sm:$0xff]   ;;  %v2744_v12 = vld [vmem:[#allocation10 + $0x28] sm:$0xff]  }
  0xdc   : > { %2310 = vmatpush3.bf16.msra.mxu0 %v2664_v17  ;;  %2468 = vmatpush3.bf16.msra.mxu1 %v2681_v25  ;;  %v2734_v13 = vld [vmem:[%s3481_s12 + $0xf0] ss:$8 sps:$4 sm:$0xff]   ;;  %v3556_v17 = vld [vmem:[%s4023_s3] ss:$0 sm:$0xff]  ;;  %s3019_s12 = scalar_lea.vmem %s3827_s25, 4096 }
  0xdd   : > { %2311 = vmatprep.subr.bf16.mxu0 %v2665_v19  ;;  %2469 = vmatprep.subr.bf16.mxu1 %v2682_v26  ;;  %v2745_v14 = vld [vmem:[#allocation10 + $0x30] sm:$0xff]   ;;  %v2746_v15 = vld [vmem:[#allocation10 + $0x38] sm:$0xff]   ;;  %p3020_p2 = scmp.ne.s32.totalorder %s3827_s25, %s3019_s12  ;;  %p3027_p6 = scmp.lt.s32.totalorder %s3025_s27, %s3019_s12 }
  0xdf   : > { %p3021_p4 = pnand %p3020_p2, %p3384_p5  ;;  %p3028_p10 = por %p3027_p6, %p3026_p8 }
  0xe0   : > { %2312 = vmatpush3.bf16.msra.mxu0 %v2667_v20  ;;  %2470 = vmatpush3.bf16.msra.mxu1 %v2682_v26 }
  0xe1   : > { %2471 = vmatprep.subr.bf16.mxu1 %v2686_v29  ;;  %p3022_p0 = pneg %p3021_p4 }
  0xe3   : > { %846 = vmatmul.mubr.bf16.vlgmr.msra.gmra.mrb[0].mxu0 %v2668_v22  ;;  %p3029_p3 = pnand %p3028_p10, %p3022_p0 }
  0xe4   : > { %853 = vmatprep.mubr.bf16.mxu0 %v2673_v23  ;;  %2472 = vmatpush3.bf16.msra.mxu1 %v2686_v29 }
  0xe5   : > { %2505 = vmatprep.subr.bf16.mxu1 %v2739_v3 }
  0xe7   : > { %2474 = vmatmul.mubr.bf16.vlgmr.msra.gmra.mrb[0].mxu1 %v2688_v30 }
  0xe8   : > { %2477 = vmatprep.mubr.bf16.mxu1 %v2695_v32  ;;  %2506 = vmatpush3.bf16.msra.mxu1 %v2739_v3 }
  0xe9   : > { %2507 = vmatprep.subr.bf16.mxu1 %v2740_v4 }
  0xeb   : > { %854 = vmatmul.mubr.bf16.gmra.mrb[4].mxu0 %v2675_v27 }
  0xec   : > { %861 = vmatprep.mubr.bf16.mxu0 %v2678_v28  ;;  %2508 = vmatpush3.bf16.msra.mxu1 %v2740_v4 }
  0xed   : > { %2509 = vmatprep.subr.bf16.mxu1 %v2741_v7 }
  0xef   : > { %2478 = vmatmul.mubr.bf16.gmra.mrb[4].mxu1 %v2696_v35 }
  0xf0   : > { %2481 = vmatprep.mubr.bf16.mxu1 %v2703_v36  ;;  %2510 = vmatpush3.bf16.msra.mxu1 %v2741_v7  ;;  %v3571_v36 = vld [vmem:[%s4025_s5] ss:$0 sm:$0xff] }
  0xf1   : > { %2511 = vmatprep.subr.bf16.mxu1 %v2742_v8 }
  0xf3   : > { %862 = vmatmul.mubr.bf16.gmra.mrb[8].mxu0 %v2680_v31 }
  0xf4   : > { %869 = vmatprep.mubr.bf16.mxu0 %v2683_v33  ;;  %2512 = vmatpush3.bf16.msra.mxu1 %v2742_v8 }
  0xf5   : > { %2513 = vmatprep.subr.bf16.mxu1 %v2743_v11 }
  0xf7   : > { %2482 = vmatmul.mubr.bf16.gmra.mrb[8].mxu1 %v2704_v39 }
  0xf8   : > { %2485 = vmatprep.mubr.bf16.mxu1 %v2711_v41  ;;  %2514 = vmatpush3.bf16.msra.mxu1 %v2743_v11 }
  0xf9   : > { %2515 = vmatprep.subr.bf16.mxu1 %v2744_v12 }
  0xfb   : > { %870 = vmatmul.mubr.bf16.gmra.mrb[12].mxu0 %v2685_v34 }
  0xfc   : > { %877 = vmatprep.mubr.bf16.mxu0 %v2689_v37  ;;  %2516 = vmatpush3.bf16.msra.mxu1 %v2744_v12 }
  0xfd   : > { %2517 = vmatprep.subr.bf16.mxu1 %v2745_v14 }
  0xff   : > { %2486 = vmatmul.mubr.bf16.gmra.mrb[12].mxu1 %v2712_v42 }
 0x100   : > { %2489 = vmatprep.mubr.bf16.mxu1 %v2719_v44  ;;  %2518 = vmatpush3.bf16.msra.mxu1 %v2745_v14 }
 0x101   : > { %2519 = vmatprep.subr.bf16.mxu1 %v2746_v15 }
 0x103   : > { %878 = vmatmul.mubr.bf16.gmra.mrb[16].mxu0 %v2691_v38 }
 0x104   : > { %885 = vmatprep.mubr.bf16.mxu0 %v2692_v40  ;;  %2520 = vmatpush3.bf16.msra.mxu1 %v2746_v15 }
 0x107   : > { %2490 = vmatmul.mubr.bf16.gmra.mrb[16].mxu1 %v2720_v46 }
 0x108   : > { %2493 = vmatprep.mubr.bf16.mxu1 %v2727_v48 }
 0x10b   : > { %886 = vmatmul.mubr.bf16.gmra.mrb[20].mxu0 %v2694_v43 }
 0x10c   : > { %893 = vmatprep.mubr.bf16.mxu0 %v2697_v45 }
 0x10f   : > { %2494 = vmatmul.mubr.bf16.gmra.mrb[20].mxu1 %v2728_v50 }
 0x110   : > { %2497 = vmatprep.mubr.bf16.mxu1 %v2735_v52 }
 0x113   : > { %894 = vmatmul.mubr.bf16.gmra.mrb[24].mxu0 %v2699_v47 }
 0x114   : > { %901 = vmatprep.mubr.bf16.mxu0 %v2700_v49 }
 0x117   : > { %2498 = vmatmul.mubr.bf16.gmra.mrb[24].mxu1 %v2736_v54 }
 0x118   : > { %2501 = vmatprep.mubr.bf16.mxu1 %v2737_v56 }
 0x11b   : > { %902 = vmatmul.mubr.bf16.gmra.mrb[28].mxu0 %v2702_v51 }
 0x11c   : > { %909 = vmatprep.mubr.bf16.mxu0 %v2705_v53 }
 0x11f   : > { %2502 = vmatmul.mubr.bf16.gmra.mrb[28].mxu1 %v2738_v58 }
 0x123   : > { %910 = vmatmul.mubr.bf16.gmra.mrb[32].mxu0 %v2707_v55 }
 0x124   : > { %917 = vmatprep.mubr.bf16.mxu0 %v2708_v57 }
 0x12b   : > { %918 = vmatmul.mubr.bf16.gmra.mrb[36].mxu0 %v2710_v59 }
 0x12c   : > { %925 = vmatprep.mubr.bf16.mxu0 %v2713_v60 }
 0x133   : > { %926 = vmatmul.mubr.bf16.gmra.mrb[40].mxu0 %v2715_v61 }
 0x134   : > { %933 = vmatprep.mubr.bf16.mxu0 %v2716_v62 }
 0x13b   : > { %934 = vmatmul.mubr.bf16.gmra.mrb[44].mxu0 %v2718_v63 }
 0x13c   : > { %941 = vmatprep.mubr.bf16.mxu0 %v2721_v0 }
 0x143   : > { %942 = vmatmul.mubr.bf16.gmra.mrb[48].mxu0 %v2723_v1 }
 0x144   : > { %949 = vmatprep.mubr.bf16.mxu0 %v2724_v2 }
 0x14b   : > { %950 = vmatmul.mubr.bf16.gmra.mrb[52].mxu0 %v2726_v5 }
 0x14c   : > { %957 = vmatprep.mubr.bf16.mxu0 %v2729_v6 }
 0x153   : > { %958 = vmatmul.mubr.bf16.gmra.mrb[56].mxu0 %v2731_v9 }
 0x154   : > { %965 = vmatprep.mubr.bf16.mxu0 %v2732_v10 }
 0x15b   : > { %966 = vmatmul.mubr.bf16.gmra.mrb[60].mxu0 %v2734_v13 }
 0x1b6   : > { %v2313_v16 = vpop.f32.mrb[0].mxu0 }
 0x1b7   : > { %v2314_v18 = vpop.f32.mrb[1].mxu0 }
 0x1b8   : > { %v2315_v19 = vadd.f32 %v2314_v18, %v2313_v16  ;;  %v2316_v20 = vpop.f32.mrb[2].mxu0 }
 0x1b9   : > { %v2317_v21 = vpop.f32.mrb[3].mxu0 }
 0x1ba   : > { %v848_v22 = vadd.f32 %v2315_v19, %v3556_v17  ;;  %v2318_v23 = vadd.f32 %v2317_v21, %v2316_v20  ;;  %v2475_v37 = vpop.f32.mrb[0].mxu1 }
 0x1bb   : > { %v3575_v40 = vadd.f32 %v2475_v37, %v3571_v36  ;;  %v1207_v41 = vpop.f32.mrb[1].mxu1 }
 0x1bc   : > { %v2239_v24 = vmul.f32 -1.442695, %v848_v22  ;;  %1806 = vst [vmem:[%s3560_s0] sm:$0xff] %v848_v22  ;;  %v851_v25 = vadd.f32 %v2318_v23, %v3556_v17  ;;  %v1208_v43 = vadd.f32 %v3571_v36, %v1207_v41  ;;  %v2476_v44 = vpop.f32.mrb[2].mxu1 }
 0x1bd   : > { %1840 = vst [vmem:[%s3579_s24 + $0x10] sm:$0xff] %v3575_v40  ;;  %v3584_v48 = vadd.f32 %v2476_v44, %v3571_v36  ;;  %v1210_v49 = vpop.f32.mrb[3].mxu1 }
 0x1be   : > { %2747 = vpow2.f32 %v2239_v24  ;;  %v2240_v26 = vmul.f32 -1.442695, %v851_v25  ;;  %1807 = vst [vmem:[%s3560_s0 + $0x8] sm:$0xff] %v851_v25  ;;  %v2319_v27 = vpop.f32.mrb[4].mxu0  ;;  %1838 = vst [vmem:[%s3579_s24] sm:$0xff] %v1208_v43  ;;  %v1211_v52 = vadd.f32 %v3571_v36, %v1210_v49 }
 0x1bf   : > { %v2320_v28 = vpop.f32.mrb[5].mxu0  ;;  %1841 = vst [vmem:[%s3579_s24 + $0x18] sm:$0xff] %v3584_v48 }
 0x1c0   : > { %2749 = vpow2.f32 %v2240_v26  ;;  %v2321_v29 = vadd.f32 %v2320_v28, %v2319_v27  ;;  %v2322_v30 = vpop.f32.mrb[6].mxu0  ;;  %1839 = vst [vmem:[%s3579_s24 + $0x8] sm:$0xff] %v1211_v52 }
 0x1c1   : > { %v2323_v31 = vpop.f32.mrb[7].mxu0 }
 0x1c2   : > { %v856_v32 = vadd.f32 %v2321_v29, %v3556_v17  ;;  %v2324_v33 = vadd.f32 %v2323_v31, %v2322_v30  ;;  %v2479_v59 = vpop.f32.mrb[4].mxu1 }
 0x1c3   : > { %v3596_v62 = vadd.f32 %v2479_v59, %v3571_v36  ;;  %v1223_v63 = vpop.f32.mrb[5].mxu1 }
 0x1c4   : > { %v2241_v34 = vmul.f32 -1.442695, %v856_v32  ;;  %1808 = vst [vmem:[%s3560_s0 + $0x10] sm:$0xff] %v856_v32  ;;  %v859_v35 = vadd.f32 %v2324_v33, %v3556_v17  ;;  %v3599_v1 = vadd.f32 %v3571_v36, %v1223_v63  ;;  %v2480_v2 = vpop.f32.mrb[6].mxu1 }
 0x1c5   : > { %1844 = vst [vmem:[%s3579_s24 + $0x30] sm:$0xff] %v3596_v62  ;;  %v3604_v6 = vadd.f32 %v2480_v2, %v3571_v36  ;;  %v1226_v7 = vpop.f32.mrb[7].mxu1 }
 0x1c6   : > { %2751 = vpow2.f32 %v2241_v34  ;;  %v2242_v38 = vmul.f32 -1.442695, %v859_v35  ;;  %1809 = vst [vmem:[%s3560_s0 + $0x18] sm:$0xff] %v859_v35  ;;  %v2325_v39 = vpop.f32.mrb[8].mxu0  ;;  %1842 = vst [vmem:[%s3579_s24 + $0x20] sm:$0xff] %v3599_v1  ;;  %v3609_v10 = vadd.f32 %v3571_v36, %v1226_v7 }
 0x1c7   : > { %v2326_v42 = vpop.f32.mrb[9].mxu0  ;;  %1845 = vst [vmem:[%s3579_s24 + $0x38] sm:$0xff] %v3604_v6 }
 0x1c8   : > { %v2748_v45 = vpop.eup %2747  ;;  %2753 = vpow2.f32 %v2242_v38  ;;  %v2327_v46 = vadd.f32 %v2326_v42, %v2325_v39  ;;  %v2328_v47 = vpop.f32.mrb[10].mxu0  ;;  %1843 = vst [vmem:[%s3579_s24 + $0x28] sm:$0xff] %v3609_v10 }
 0x1c9   : > { %v1430_v50 = vadd.f32 1.0, %v2748_v45  ;;  %v2329_v51 = vpop.f32.mrb[11].mxu0 }
 0x1ca   : > { %v2750_v53 = vpop.eup %2749  ;;  %v864_v54 = vadd.f32 %v2327_v46, %v3556_v17  ;;  %v2330_v55 = vadd.f32 %v2329_v51, %v2328_v47  ;;  %v2483_v19 = vpop.f32.mrb[8].mxu1 }
 0x1cb   : > { %2755 = vrcp.f32 %v1430_v50  ;;  %v1431_v56 = vadd.f32 1.0, %v2750_v53  ;;  %v3620_v23 = vadd.f32 %v2483_v19, %v3571_v36  ;;  %v1239_v24 = vpop.f32.mrb[9].mxu1 }
 0x1cc   : > { %v2243_v57 = vmul.f32 -1.442695, %v864_v54  ;;  %1810 = vst [vmem:[%s3560_s0 + $0x20] sm:$0xff] %v864_v54  ;;  %v867_v58 = vadd.f32 %v2330_v55, %v3556_v17  ;;  %v3623_v27 = vadd.f32 %v3571_v36, %v1239_v24  ;;  %v2484_v28 = vpop.f32.mrb[10].mxu1 }
 0x1cd   : > { %2757 = vrcp.f32 %v1431_v56  ;;  %1848 = vst [vmem:[%s3579_s24 + $0x50] sm:$0xff] %v3620_v23  ;;  %v3628_v33 = vadd.f32 %v2484_v28, %v3571_v36  ;;  %v1242_v34 = vpop.f32.mrb[11].mxu1 }
 0x1ce   : > { %2759 = vpow2.f32 %v2243_v57  ;;  %v2244_v60 = vmul.f32 -1.442695, %v867_v58  ;;  %1811 = vst [vmem:[%s3560_s0 + $0x28] sm:$0xff] %v867_v58  ;;  %v2331_v61 = vpop.f32.mrb[12].mxu0  ;;  %1846 = vst [vmem:[%s3579_s24 + $0x40] sm:$0xff] %v3623_v27  ;;  %v3633_v38 = vadd.f32 %v3571_v36, %v1242_v34 }
 0x1cf   : > { %v2332_v0 = vpop.f32.mrb[13].mxu0  ;;  %1849 = vst [vmem:[%s3579_s24 + $0x58] sm:$0xff] %v3628_v33 }
 0x1d0   : > { %v2752_v3 = vpop.eup %2751  ;;  %2761 = vpow2.f32 %v2244_v60  ;;  %v2333_v4 = vadd.f32 %v2332_v0, %v2331_v61  ;;  %v2334_v5 = vpop.f32.mrb[14].mxu0  ;;  %1847 = vst [vmem:[%s3579_s24 + $0x48] sm:$0xff] %v3633_v38 }
 0x1d1   : > { %v1432_v8 = vadd.f32 1.0, %v2752_v3  ;;  %v2335_v9 = vpop.f32.mrb[15].mxu0 }
 0x1d2   : > { %v2754_v11 = vpop.eup %2753  ;;  %v872_v12 = vadd.f32 %v2333_v4, %v3556_v17  ;;  %v2336_v13 = vadd.f32 %v2335_v9, %v2334_v5  ;;  %v2487_v49 = vpop.f32.mrb[12].mxu1 }
 0x1d3   : > { %2763 = vrcp.f32 %v1432_v8  ;;  %v1433_v14 = vadd.f32 1.0, %v2754_v11  ;;  %v3645_v53 = vadd.f32 %v2487_v49, %v3571_v36  ;;  %v1255_v54 = vpop.f32.mrb[13].mxu1 }
 0x1d4   : > { %v2245_v15 = vmul.f32 -1.442695, %v872_v12  ;;  %1812 = vst [vmem:[%s3560_s0 + $0x30] sm:$0xff] %v872_v12  ;;  %v875_v16 = vadd.f32 %v2336_v13, %v3556_v17  ;;  %v3648_v57 = vadd.f32 %v3571_v36, %v1255_v54  ;;  %v2488_v58 = vpop.f32.mrb[14].mxu1 }
 0x1d5   : > { %v2756_v18 = vpop.eup %2755  ;;  %2765 = vrcp.f32 %v1433_v14  ;;  %1852 = vst [vmem:[%s3579_s24 + $0x70] sm:$0xff] %v3645_v53  ;;  %v3654_v63 = vadd.f32 %v2488_v58, %v3571_v36  ;;  %v1258_v0 = vpop.f32.mrb[15].mxu1 }
 0x1d6   : > { %2767 = vpow2.f32 %v2245_v15  ;;  %v2246_v20 = vmul.f32 -1.442695, %v875_v16  ;;  %1813 = vst [vmem:[%s3560_s0 + $0x38] sm:$0xff] %v875_v16  ;;  %v1526_v21 = vmul.f32 %v2756_v18, %v1208_v43  ;;  %v2337_v22 = vpop.f32.mrb[16].mxu0  ;;  %1850 = vst [vmem:[%s3579_s24 + $0x60] sm:$0xff] %v3648_v57  ;;  %v3659_v4 = vadd.f32 %v3571_v36, %v1258_v0 }
 0x1d7   : > { %v2758_v25 = vpop.eup %2757  ;;  %v2338_v26 = vpop.f32.mrb[17].mxu0  ;;  %1853 = vst [vmem:[%s3579_s24 + $0x78] sm:$0xff] %v3654_v63 }
 0x1d8   : > { %v2760_v29 = vpop.eup %2759  ;;  %2769 = vpow2.f32 %v2246_v20  ;;  %v1527_v30 = vmul.f32 %v2758_v25, %v1211_v52  ;;  %v2339_v31 = vadd.f32 %v2338_v26, %v2337_v22  ;;  %v2340_v32 = vpop.f32.mrb[18].mxu0  ;;  %1851 = vst [vmem:[%s3579_s24 + $0x68] sm:$0xff] %v3659_v4 }
 0x1d9   : > { %v1434_v35 = vadd.f32 1.0, %v2760_v29  ;;  %v2341_v37 = vpop.f32.mrb[19].mxu0 }
 0x1da   : > { %v2762_v39 = vpop.eup %2761  ;;  %v880_v41 = vadd.f32 %v2339_v31, %v3556_v17  ;;  %v2342_v42 = vadd.f32 %v2341_v37, %v2340_v32  ;;  %v1558_v43 = vpack.c.bf16 %v1527_v30, %v1526_v21  ;;  %v2491_v14 = vpop.f32.mrb[16].mxu1 }
 0x1db   : > { %2771 = vrcp.f32 %v1434_v35  ;;  %v1435_v44 = vadd.f32 1.0, %v2762_v39  ;;  %v3671_v19 = vadd.f32 %v2491_v14, %v3571_v36  ;;  %v1271_v20 = vpop.f32.mrb[17].mxu1 }
 0x1dc   : > { %v2247_v45 = vmul.f32 -1.442695, %v880_v41  ;;  %1814 = vst [vmem:[%s3560_s0 + $0x40] sm:$0xff] %v880_v41  ;;  %v883_v46 = vadd.f32 %v2342_v42, %v3556_v17  ;;  %2521 = vmatprep.mubr.bf16.mxu1 %v1558_v43  ;;  %v3674_v24 = vadd.f32 %v3571_v36, %v1271_v20  ;;  %v2492_v25 = vpop.f32.mrb[18].mxu1 }
 0x1dd   : > { %v2764_v47 = vpop.eup %2763  ;;  %2773 = vrcp.f32 %v1435_v44  ;;  %1856 = vst [vmem:[%s3579_s24 + $0x90] sm:$0xff] %v3671_v19  ;;  %v3680_v30 = vadd.f32 %v2492_v25, %v3571_v36  ;;  %v1274_v31 = vpop.f32.mrb[19].mxu1 }
 0x1de   : > { %v1528_v50 = vmul.f32 %v2764_v47, %v3575_v40  ;;  %2775 = vpow2.f32 %v2247_v45  ;;  %v2248_v51 = vmul.f32 -1.442695, %v883_v46  ;;  %1815 = vst [vmem:[%s3560_s0 + $0x48] sm:$0xff] %v883_v46  ;;  %v2343_v52 = vpop.f32.mrb[20].mxu0  ;;  %1854 = vst [vmem:[%s3579_s24 + $0x80] sm:$0xff] %v3674_v24  ;;  %v3685_v35 = vadd.f32 %v3571_v36, %v1274_v31 }
 0x1df   : > { %v2766_v55 = vpop.eup %2765  ;;  %v2344_v56 = vpop.f32.mrb[21].mxu0  ;;  %1857 = vst [vmem:[%s3579_s24 + $0x98] sm:$0xff] %v3680_v30 }
 0x1e0   : > { %v2768_v59 = vpop.eup %2767  ;;  %v1529_v40 = vmul.f32 %v2766_v55, %v3584_v48  ;;  %2777 = vpow2.f32 %v2248_v51  ;;  %v2345_v60 = vadd.f32 %v2344_v56, %v2343_v52  ;;  %v2346_v61 = vpop.f32.mrb[22].mxu0  ;;  %1855 = vst [vmem:[%s3579_s24 + $0x88] sm:$0xff] %v3685_v35 }
 0x1e1   : > { %v1436_v2 = vadd.f32 1.0, %v2768_v59  ;;  %v2347_v3 = vpop.f32.mrb[23].mxu0 }
 0x1e2   : > { %v2770_v5 = vpop.eup %2769  ;;  %v1559_v48 = vpack.c.bf16 %v1529_v40, %v1528_v50  ;;  %v888_v7 = vadd.f32 %v2345_v60, %v3556_v17  ;;  %v2348_v8 = vadd.f32 %v2347_v3, %v2346_v61  ;;  %v2495_v46 = vpop.f32.mrb[20].mxu1 }
 0x1e3   : > { %2779 = vrcp.f32 %v1436_v2  ;;  %v1437_v9 = vadd.f32 1.0, %v2770_v5  ;;  %v3697_v51 = vadd.f32 %v2495_v46, %v3571_v36  ;;  %v1287_v52 = vpop.f32.mrb[21].mxu1 }
 0x1e4   : > { %v2249_v11 = vmul.f32 -1.442695, %v888_v7  ;;  %1816 = vst [vmem:[%s3560_s0 + $0x50] sm:$0xff] %v888_v7  ;;  %v891_v12 = vadd.f32 %v2348_v8, %v3556_v17  ;;  %2522 = vmatmul.mubr.bf16.vlgmr.msra.gmra.mrb[32].mxu1 %v1559_v48  ;;  %v3700_v56 = vadd.f32 %v3571_v36, %v1287_v52  ;;  %v2496_v58 = vpop.f32.mrb[22].mxu1 }
 0x1e5   : > { %v2772_v13 = vpop.eup %2771  ;;  %2781 = vrcp.f32 %v1437_v9  ;;  %1860 = vst [vmem:[%s3579_s24 + $0xb0] sm:$0xff] %v3697_v51  ;;  %v3706_v61 = vadd.f32 %v2496_v58, %v3571_v36  ;;  %v1290_v0 = vpop.f32.mrb[23].mxu1 }
 0x1e6   : > { %2783 = vpow2.f32 %v2249_v11  ;;  %v2250_v15 = vmul.f32 -1.442695, %v891_v12  ;;  %1817 = vst [vmem:[%s3560_s0 + $0x58] sm:$0xff] %v891_v12  ;;  %v1530_v16 = vmul.f32 %v2772_v13, %v3599_v1  ;;  %v2349_v18 = vpop.f32.mrb[24].mxu0  ;;  %1858 = vst [vmem:[%s3579_s24 + $0xa0] sm:$0xff] %v3700_v56  ;;  %v3711_v5 = vadd.f32 %v3571_v36, %v1290_v0 }
 0x1e7   : > { %v2774_v21 = vpop.eup %2773  ;;  %v2350_v22 = vpop.f32.mrb[25].mxu0  ;;  %1861 = vst [vmem:[%s3579_s24 + $0xb8] sm:$0xff] %v3706_v61 }
 0x1e8   : > { %v2776_v26 = vpop.eup %2775  ;;  %2785 = vpow2.f32 %v2250_v15  ;;  %v1531_v28 = vmul.f32 %v2774_v21, %v3609_v10  ;;  %v2351_v29 = vadd.f32 %v2350_v22, %v2349_v18  ;;  %v2352_v1 = vpop.f32.mrb[26].mxu0  ;;  %1859 = vst [vmem:[%s3579_s24 + $0xa8] sm:$0xff] %v3711_v5 }
 0x1e9   : > { %v1438_v32 = vadd.f32 1.0, %v2776_v26  ;;  %v2353_v34 = vpop.f32.mrb[27].mxu0 }
 0x1ea   : > { %v2778_v37 = vpop.eup %2777  ;;  %v896_v10 = vadd.f32 %v2351_v29, %v3556_v17  ;;  %v2354_v39 = vadd.f32 %v2353_v34, %v2352_v1  ;;  %v1560_v41 = vpack.c.bf16 %v1531_v28, %v1530_v16  ;;  %v2499_v14 = vpop.f32.mrb[24].mxu1 }
 0x1eb   : > { %2787 = vrcp.f32 %v1438_v32  ;;  %v1439_v42 = vadd.f32 1.0, %v2778_v37  ;;  %v3723_v20 = vadd.f32 %v2499_v14, %v3571_v36  ;;  %v1303_v21 = vpop.f32.mrb[25].mxu1 }
 0x1ec   : > { %v2251_v43 = vmul.f32 -1.442695, %v896_v10  ;;  %1818 = vst [vmem:[%s3560_s0 + $0x60] sm:$0xff] %v896_v10  ;;  %v899_v44 = vadd.f32 %v2354_v39, %v3556_v17  ;;  %2525 = vmatprep.mubr.bf16.mxu1 %v1560_v41  ;;  %v3726_v26 = vadd.f32 %v3571_v36, %v1303_v21  ;;  %v2500_v28 = vpop.f32.mrb[26].mxu1 }
 0x1ed   : > { %v2780_v45 = vpop.eup %2779  ;;  %2789 = vrcp.f32 %v1439_v42  ;;  %1864 = vst [vmem:[%s3579_s24 + $0xd0] sm:$0xff] %v3723_v20  ;;  %v3732_v32 = vadd.f32 %v2500_v28, %v3571_v36  ;;  %v1306_v34 = vpop.f32.mrb[27].mxu1 }
 0x1ee   : > { %v1532_v47 = vmul.f32 %v2780_v45, %v3596_v62  ;;  %2791 = vpow2.f32 %v2251_v43  ;;  %v2252_v49 = vmul.f32 -1.442695, %v899_v44  ;;  %1819 = vst [vmem:[%s3560_s0 + $0x68] sm:$0xff] %v899_v44  ;;  %v2355_v50 = vpop.f32.mrb[28].mxu0  ;;  %1862 = vst [vmem:[%s3579_s24 + $0xc0] sm:$0xff] %v3726_v26  ;;  %v3737_v39 = vadd.f32 %v3571_v36, %v1306_v34 }
 0x1ef   : > { %v2782_v54 = vpop.eup %2781  ;;  %v2356_v55 = vpop.f32.mrb[29].mxu0  ;;  %1865 = vst [vmem:[%s3579_s24 + $0xd8] sm:$0xff] %v3732_v32 }
 0x1f0   : > { %v2784_v59 = vpop.eup %2783  ;;  %v1533_v62 = vmul.f32 %v2782_v54, %v3604_v6  ;;  %2793 = vpow2.f32 %v2252_v49  ;;  %v2357_v40 = vadd.f32 %v2356_v55, %v2355_v50  ;;  %v2358_v60 = vpop.f32.mrb[30].mxu0  ;;  %1863 = vst [vmem:[%s3579_s24 + $0xc8] sm:$0xff] %v3737_v39 }
 0x1f1   : > { %v1440_v2 = vadd.f32 1.0, %v2784_v59  ;;  %v2359_v3 = vpop.f32.mrb[31].mxu0 }
 0x1f2   : > { %v2786_v48 = vpop.eup %2785  ;;  %v904_v6 = vadd.f32 %v2357_v40, %v3556_v17  ;;  %v2360_v7 = vadd.f32 %v2359_v3, %v2358_v60  ;;  %v1561_v8 = vpack.c.bf16 %v1533_v62, %v1532_v47  ;;  %v2503_v49 = vpop.f32.mrb[28].mxu1 }
 0x1f3   : > { %2795 = vrcp.f32 %v1440_v2  ;;  %v1441_v9 = vadd.f32 1.0, %v2786_v48  ;;  %v3749_v55 = vadd.f32 %v2503_v49, %v3571_v36  ;;  %v1319_v58 = vpop.f32.mrb[29].mxu1 }
 0x1f4   : > { %v2253_v11 = vmul.f32 -1.442695, %v904_v6  ;;  %1820 = vst [vmem:[%s3560_s0 + $0x70] sm:$0xff] %v904_v6  ;;  %v907_v12 = vadd.f32 %v2360_v7, %v3556_v17  ;;  %2526 = vmatmul.mubr.bf16.gmra.mrb[36].mxu1 %v1561_v8  ;;  %v3752_v40 = vadd.f32 %v3571_v36, %v1319_v58  ;;  %v2504_v60 = vpop.f32.mrb[30].mxu1 }
 0x1f5   : > { %v2788_v13 = vpop.eup %2787  ;;  %2797 = vrcp.f32 %v1441_v9  ;;  %1868 = vst [vmem:[%s3579_s24 + $0xf0] sm:$0xff] %v3749_v55  ;;  %v3758_v48 = vadd.f32 %v2504_v60, %v3571_v36  ;;  %v1322_v6 = vpop.f32.mrb[31].mxu1 }
 0x1f6   : > { %2799 = vpow2.f32 %v2253_v11  ;;  %v2254_v15 = vmul.f32 -1.442695, %v907_v12  ;;  %1821 = vst [vmem:[%s3560_s0 + $0x78] sm:$0xff] %v907_v12  ;;  %v1534_v16 = vmul.f32 %v2788_v13, %v3623_v27  ;;  %v2361_v18 = vpop.f32.mrb[32].mxu0  ;;  %1866 = vst [vmem:[%s3579_s24 + $0xe0] sm:$0xff] %v3752_v40  ;;  %v3763_v9 = vadd.f32 %v3571_v36, %v1322_v6 }
 0x1f7   : > { %v2790_v22 = vpop.eup %2789  ;;  %v2362_v25 = vpop.f32.mrb[33].mxu0  ;;  %1869 = vst [vmem:[%s3579_s24 + $0xf8] sm:$0xff] %v3758_v48 }
 0x1f8   : > { %v2792_v29 = vpop.eup %2791  ;;  %2801 = vpow2.f32 %v2254_v15  ;;  %v1535_v1 = vmul.f32 %v2790_v22, %v3633_v38  ;;  %v2363_v31 = vadd.f32 %v2362_v25, %v2361_v18  ;;  %v2364_v27 = vpop.f32.mrb[34].mxu0  ;;  %1867 = vst [vmem:[%s3579_s24 + $0xe8] sm:$0xff] %v3763_v9 }
 0x1f9   : > { %v1442_v37 = vadd.f32 1.0, %v2792_v29  ;;  %v2365_v10 = vpop.f32.mrb[35].mxu0 }
 0x1fa   : > { %v2794_v41 = vpop.eup %2793  ;;  %v912_v38 = vadd.f32 %v2363_v31, %v3556_v17  ;;  %v2366_v42 = vadd.f32 %v2365_v10, %v2364_v27  ;;  %v1562_v43 = vpack.c.bf16 %v1535_v1, %v1534_v16 }
 0x1fb   : > { %2803 = vrcp.f32 %v1442_v37  ;;  %v1443_v44 = vadd.f32 1.0, %v2794_v41 }
 0x1fc   : > { %v2255_v45 = vmul.f32 -1.442695, %v912_v38  ;;  %1822 = vst [vmem:[%s3560_s0 + $0x80] sm:$0xff] %v912_v38  ;;  %v915_v46 = vadd.f32 %v2366_v42, %v3556_v17  ;;  %2529 = vmatprep.mubr.bf16.mxu1 %v1562_v43 }
 0x1fd   : > { %v2796_v47 = vpop.eup %2795  ;;  %2805 = vrcp.f32 %v1443_v44 }
 0x1fe   : > { %v1536_v50 = vmul.f32 %v2796_v47, %v3620_v23  ;;  %2807 = vpow2.f32 %v2255_v45  ;;  %v2256_v52 = vmul.f32 -1.442695, %v915_v46  ;;  %1823 = vst [vmem:[%s3560_s0 + $0x88] sm:$0xff] %v915_v46  ;;  %v2367_v54 = vpop.f32.mrb[36].mxu0 }
 0x1ff   : > { %v2798_v59 = vpop.eup %2797  ;;  %v2368_v62 = vpop.f32.mrb[37].mxu0 }
 0x200   : > { %v2800_v0 = vpop.eup %2799  ;;  %v1537_v23 = vmul.f32 %v2798_v59, %v3628_v33  ;;  %2809 = vpow2.f32 %v2256_v52  ;;  %v2369_v2 = vadd.f32 %v2368_v62, %v2367_v54  ;;  %v2370_v3 = vpop.f32.mrb[38].mxu0 }
 0x201   : > { %v1444_v7 = vadd.f32 1.0, %v2800_v0  ;;  %v2371_v8 = vpop.f32.mrb[39].mxu0 }
 0x202   : > { %v2802_v11 = vpop.eup %2801  ;;  %v920_v33 = vadd.f32 %v2369_v2, %v3556_v17  ;;  %v2372_v12 = vadd.f32 %v2371_v8, %v2370_v3  ;;  %v1563_v13 = vpack.c.bf16 %v1537_v23, %v1536_v50 }
 0x203   : > { %2811 = vrcp.f32 %v1444_v7  ;;  %v1445_v14 = vadd.f32 1.0, %v2802_v11 }
 0x204   : > { %v2257_v15 = vmul.f32 -1.442695, %v920_v33  ;;  %1824 = vst [vmem:[%s3560_s0 + $0x90] sm:$0xff] %v920_v33  ;;  %v923_v16 = vadd.f32 %v2372_v12, %v3556_v17  ;;  %2530 = vmatmul.mubr.bf16.gmra.mrb[40].mxu1 %v1563_v13 }
 0x205   : > { %v2804_v18 = vpop.eup %2803  ;;  %2813 = vrcp.f32 %v1445_v14 }
 0x206   : > { %2815 = vpow2.f32 %v2257_v15  ;;  %v2258_v36 = vmul.f32 -1.442695, %v923_v16  ;;  %1825 = vst [vmem:[%s3560_s0 + $0x98] sm:$0xff] %v923_v16  ;;  %v1538_v21 = vmul.f32 %v2804_v18, %v3648_v57  ;;  %v2373_v22 = vpop.f32.mrb[40].mxu0 }
 0x207   : > { %v2806_v25 = vpop.eup %2805  ;;  %v2374_v28 = vpop.f32.mrb[41].mxu0 }
 0x208   : > { %v2808_v29 = vpop.eup %2807  ;;  %2817 = vpow2.f32 %v2258_v36  ;;  %v1539_v1 = vmul.f32 %v2806_v25, %v3659_v4  ;;  %v2375_v31 = vadd.f32 %v2374_v28, %v2373_v22  ;;  %v2376_v27 = vpop.f32.mrb[42].mxu0 }
 0x209   : > { %v1446_v34 = vadd.f32 1.0, %v2808_v29  ;;  %v2377_v37 = vpop.f32.mrb[43].mxu0 }
 0x20a   : > { %v2810_v10 = vpop.eup %2809  ;;  %v928_v41 = vadd.f32 %v2375_v31, %v3556_v17  ;;  %v2378_v38 = vadd.f32 %v2377_v37, %v2376_v27  ;;  %v1564_v42 = vpack.c.bf16 %v1539_v1, %v1538_v21 }
 0x20b   : > { %2819 = vrcp.f32 %v1446_v34  ;;  %v1447_v57 = vadd.f32 1.0, %v2810_v10 }
 0x20c   : > { %v2259_v43 = vmul.f32 -1.442695, %v928_v41  ;;  %1826 = vst [vmem:[%s3560_s0 + $0xa0] sm:$0xff] %v928_v41  ;;  %v931_v44 = vadd.f32 %v2378_v38, %v3556_v17  ;;  %2533 = vmatprep.mubr.bf16.mxu1 %v1564_v42 }
 0x20d   : > { %v2812_v45 = vpop.eup %2811  ;;  %2821 = vrcp.f32 %v1447_v57 }
 0x20e   : > { %v1540_v4 = vmul.f32 %v2812_v45, %v3645_v53  ;;  %2823 = vpow2.f32 %v2259_v43  ;;  %v2260_v46 = vmul.f32 -1.442695, %v931_v44  ;;  %1827 = vst [vmem:[%s3560_s0 + $0xa8] sm:$0xff] %v931_v44  ;;  %v2379_v47 = vpop.f32.mrb[44].mxu0 }
 0x20f   : > { %v2814_v49 = vpop.eup %2813  ;;  %v2380_v50 = vpop.f32.mrb[45].mxu0 }
 0x210   : > { %v2816_v52 = vpop.eup %2815  ;;  %v1541_v54 = vmul.f32 %v2814_v49, %v3654_v63  ;;  %2825 = vpow2.f32 %v2260_v46  ;;  %v2381_v58 = vadd.f32 %v2380_v50, %v2379_v47  ;;  %v2382_v59 = vpop.f32.mrb[46].mxu0 }
 0x211   : > { %v1448_v62 = vadd.f32 1.0, %v2816_v52  ;;  %v2383_v60 = vpop.f32.mrb[47].mxu0 }
 0x212   : > { %v2818_v0 = vpop.eup %2817  ;;  %v936_v23 = vadd.f32 %v2381_v58, %v3556_v17  ;;  %v2384_v53 = vadd.f32 %v2383_v60, %v2382_v59  ;;  %v1565_v2 = vpack.c.bf16 %v1541_v54, %v1540_v4 }
 0x213   : > { %2827 = vrcp.f32 %v1448_v62  ;;  %v1449_v3 = vadd.f32 1.0, %v2818_v0 }
 0x214   : > { %v2261_v6 = vmul.f32 -1.442695, %v936_v23  ;;  %1828 = vst [vmem:[%s3560_s0 + $0xb0] sm:$0xff] %v936_v23  ;;  %v939_v7 = vadd.f32 %v2384_v53, %v3556_v17  ;;  %2534 = vmatmul.mubr.bf16.gmra.mrb[44].mxu1 %v1565_v2 }
 0x215   : > { %v2820_v8 = vpop.eup %2819  ;;  %2829 = vrcp.f32 %v1449_v3 }
 0x216   : > { %2831 = vpow2.f32 %v2261_v6  ;;  %v2262_v63 = vmul.f32 -1.442695, %v939_v7  ;;  %1829 = vst [vmem:[%s3560_s0 + $0xb8] sm:$0xff] %v939_v7  ;;  %v1542_v11 = vmul.f32 %v2820_v8, %v3674_v24  ;;  %v2385_v33 = vpop.f32.mrb[48].mxu0 }
 0x217   : > { %v2822_v12 = vpop.eup %2821  ;;  %v2386_v13 = vpop.f32.mrb[49].mxu0 }
 0x218   : > { %v2824_v14 = vpop.eup %2823  ;;  %2833 = vpow2.f32 %v2262_v63  ;;  %v1543_v15 = vmul.f32 %v2822_v12, %v3685_v35  ;;  %v2387_v16 = vadd.f32 %v2386_v13, %v2385_v33  ;;  %v2388_v18 = vpop.f32.mrb[50].mxu0 }
 0x219   : > { %v1450_v36 = vadd.f32 1.0, %v2824_v14  ;;  %v2389_v21 = vpop.f32.mrb[51].mxu0 }
 0x21a   : > { %v2826_v22 = vpop.eup %2825  ;;  %v944_v25 = vadd.f32 %v2387_v16, %v3556_v17  ;;  %v2390_v28 = vadd.f32 %v2389_v21, %v2388_v18  ;;  %v1566_v29 = vpack.c.bf16 %v1543_v15, %v1542_v11 }
 0x21b   : > { %2835 = vrcp.f32 %v1450_v36  ;;  %v1451_v24 = vadd.f32 1.0, %v2826_v22 }
 0x21c   : > { %v2263_v1 = vmul.f32 -1.442695, %v944_v25  ;;  %1830 = vst [vmem:[%s3560_s0 + $0xc0] sm:$0xff] %v944_v25  ;;  %v947_v31 = vadd.f32 %v2390_v28, %v3556_v17  ;;  %2537 = vmatprep.mubr.bf16.mxu1 %v1566_v29 }
 0x21d   : > { %v2828_v27 = vpop.eup %2827  ;;  %2837 = vrcp.f32 %v1451_v24 }
 0x21e   : > { %v1544_v35 = vmul.f32 %v2828_v27, %v3671_v19  ;;  %2839 = vpow2.f32 %v2263_v1  ;;  %v2264_v34 = vmul.f32 -1.442695, %v947_v31  ;;  %1831 = vst [vmem:[%s3560_s0 + $0xc8] sm:$0xff] %v947_v31  ;;  %v2391_v37 = vpop.f32.mrb[52].mxu0 }
 0x21f   : > { %v2830_v10 = vpop.eup %2829  ;;  %v2392_v41 = vpop.f32.mrb[53].mxu0 }
 0x220   : > { %v2832_v38 = vpop.eup %2831  ;;  %v1545_v42 = vmul.f32 %v2830_v10, %v3680_v30  ;;  %2841 = vpow2.f32 %v2264_v34  ;;  %v2393_v57 = vadd.f32 %v2392_v41, %v2391_v37  ;;  %v2394_v43 = vpop.f32.mrb[54].mxu0 }
 0x221   : > { %v1452_v44 = vadd.f32 1.0, %v2832_v38  ;;  %v2395_v45 = vpop.f32.mrb[55].mxu0 }
 0x222   : > { %v2834_v4 = vpop.eup %2833  ;;  %v952_v46 = vadd.f32 %v2393_v57, %v3556_v17  ;;  %v2396_v19 = vadd.f32 %v2395_v45, %v2394_v43  ;;  %v1567_v47 = vpack.c.bf16 %v1545_v42, %v1544_v35 }
 0x223   : > { %2843 = vrcp.f32 %v1452_v44  ;;  %v1453_v49 = vadd.f32 1.0, %v2834_v4 }
 0x224   : > { %v2265_v50 = vmul.f32 -1.442695, %v952_v46  ;;  %1832 = vst [vmem:[%s3560_s0 + $0xd0] sm:$0xff] %v952_v46  ;;  %v955_v52 = vadd.f32 %v2396_v19, %v3556_v17  ;;  %2538 = vmatmul.mubr.bf16.gmra.mrb[48].mxu1 %v1567_v47 }
 0x225   : > { %v2836_v54 = vpop.eup %2835  ;;  %2845 = vrcp.f32 %v1453_v49 }
 0x226   : > { %2847 = vpow2.f32 %v2265_v50  ;;  %v2266_v30 = vmul.f32 -1.442695, %v955_v52  ;;  %1833 = vst [vmem:[%s3560_s0 + $0xd8] sm:$0xff] %v955_v52  ;;  %v1546_v58 = vmul.f32 %v2836_v54, %v3700_v56  ;;  %v2397_v59 = vpop.f32.mrb[56].mxu0 }
 0x227   : > { %v2838_v62 = vpop.eup %2837  ;;  %v2398_v60 = vpop.f32.mrb[57].mxu0 }
 0x228   : > { %v2840_v0 = vpop.eup %2839  ;;  %2849 = vpow2.f32 %v2266_v30  ;;  %v1547_v23 = vmul.f32 %v2838_v62, %v3711_v5  ;;  %v2399_v53 = vadd.f32 %v2398_v60, %v2397_v59  ;;  %v2400_v2 = vpop.f32.mrb[58].mxu0 }
 0x229   : > { %v1454_v3 = vadd.f32 1.0, %v2840_v0  ;;  %v2401_v6 = vpop.f32.mrb[59].mxu0 }
 0x22a   : > { %v2842_v7 = vpop.eup %2841  ;;  %v960_v8 = vadd.f32 %v2399_v53, %v3556_v17  ;;  %v2402_v63 = vadd.f32 %v2401_v6, %v2400_v2  ;;  %v1568_v11 = vpack.c.bf16 %v1547_v23, %v1546_v58 }
 0x22b   : > { %2851 = vrcp.f32 %v1454_v3  ;;  %v1455_v56 = vadd.f32 1.0, %v2842_v7 }
 0x22c   : > { %v2267_v33 = vmul.f32 -1.442695, %v960_v8  ;;  %1834 = vst [vmem:[%s3560_s0 + $0xe0] sm:$0xff] %v960_v8  ;;  %v963_v12 = vadd.f32 %v2402_v63, %v3556_v17  ;;  %2541 = vmatprep.mubr.bf16.mxu1 %v1568_v11 }
 0x22d   : > { %v2844_v13 = vpop.eup %2843  ;;  %2853 = vrcp.f32 %v1455_v56 }
 0x22e   : > { %v1548_v5 = vmul.f32 %v2844_v13, %v3697_v51  ;;  %2855 = vpow2.f32 %v2267_v33  ;;  %v2268_v14 = vmul.f32 -1.442695, %v963_v12  ;;  %1835 = vst [vmem:[%s3560_s0 + $0xe8] sm:$0xff] %v963_v12  ;;  %v2403_v15 = vpop.f32.mrb[60].mxu0 }
 0x22f   : > { %v2846_v16 = vpop.eup %2845  ;;  %v2404_v18 = vpop.f32.mrb[61].mxu0 }
 0x230   : > { %v2848_v36 = vpop.eup %2847  ;;  %v1549_v21 = vmul.f32 %v2846_v16, %v3706_v61  ;;  %2857 = vpow2.f32 %v2268_v14  ;;  %v2405_v22 = vadd.f32 %v2404_v18, %v2403_v15  ;;  %v2406_v25 = vpop.f32.mrb[62].mxu0 }
 0x231   : > { %v1456_v28 = vadd.f32 1.0, %v2848_v36  ;;  %v2407_v29 = vpop.f32.mrb[63].mxu0 }
 0x232   : > { %v2850_v24 = vpop.eup %2849  ;;  %v968_v1 = vadd.f32 %v2405_v22, %v3556_v17  ;;  %v2408_v51 = vadd.f32 %v2407_v29, %v2406_v25  ;;  %v1569_v31 = vpack.c.bf16 %v1549_v21, %v1548_v5 }
 0x233   : > { %2859 = vrcp.f32 %v1456_v28  ;;  %v1457_v27 = vadd.f32 1.0, %v2850_v24 }
 0x234   : > { %v2269_v35 = vmul.f32 -1.442695, %v968_v1  ;;  %1836 = vst [vmem:[%s3560_s0 + $0xf0] sm:$0xff] %v968_v1  ;;  %v971_v34 = vadd.f32 %v2408_v51, %v3556_v17  ;;  %2542 = vmatmul.mubr.bf16.gmra.mrb[52].mxu1 %v1569_v31 }
 0x235   : > { %v2852_v37 = vpop.eup %2851  ;;  %2861 = vrcp.f32 %v1457_v27 }
 0x236   : > { %2863 = vpow2.f32 %v2269_v35  ;;  %v2270_v61 = vmul.f32 -1.442695, %v971_v34  ;;  %1837 = vst [vmem:[%s3560_s0 + $0xf8] sm:$0xff] %v971_v34  ;;  %v1550_v10 = vmul.f32 %v2852_v37, %v3726_v26 }
 0x237   : > { %v2854_v41 = vpop.eup %2853 }
 0x238   : > { %v2856_v38 = vpop.eup %2855  ;;  %2865 = vpow2.f32 %v2270_v61  ;;  %v1551_v42 = vmul.f32 %v2854_v41, %v3737_v39 }
 0x239   : > { %v1458_v57 = vadd.f32 1.0, %v2856_v38 }
 0x23a   : > { %v2858_v43 = vpop.eup %2857  ;;  %v1570_v44 = vpack.c.bf16 %v1551_v42, %v1550_v10 }
 0x23b   : > { %2867 = vrcp.f32 %v1458_v57  ;;  %v1459_v45 = vadd.f32 1.0, %v2858_v43 }
 0x23c   : > { %2545 = vmatprep.mubr.bf16.mxu1 %v1570_v44 }
 0x23d   : > { %v2860_v17 = vpop.eup %2859  ;;  %2869 = vrcp.f32 %v1459_v45 }
 0x23e   : > { %v1552_v19 = vmul.f32 %v2860_v17, %v3723_v20 }
 0x23f   : > { %v2862_v4 = vpop.eup %2861 }
 0x240   : > { %v2864_v46 = vpop.eup %2863  ;;  %v1553_v47 = vmul.f32 %v2862_v4, %v3732_v32 }
 0x241   : > { %v1460_v26 = vadd.f32 1.0, %v2864_v46 }
 0x242   : > { %v2866_v49 = vpop.eup %2865  ;;  %v1571_v50 = vpack.c.bf16 %v1553_v47, %v1552_v19 }
 0x243   : > { %2871 = vrcp.f32 %v1460_v26  ;;  %v1461_v39 = vadd.f32 1.0, %v2866_v49 }
 0x244   : > { %2546 = vmatmul.mubr.bf16.gmra.mrb[56].mxu1 %v1571_v50 }
 0x245   : > { %v2868_v52 = vpop.eup %2867  ;;  %2873 = vrcp.f32 %v1461_v39 }
 0x246   : > { %v1554_v30 = vmul.f32 %v2868_v52, %v3752_v40 }
 0x247   : > { %v2870_v54 = vpop.eup %2869 }
 0x248   : > { %v1555_v58 = vmul.f32 %v2870_v54, %v3763_v9 }
 0x24a   : > { %v1572_v20 = vpack.c.bf16 %v1555_v58, %v1554_v30 }
 0x24c   : > { %2549 = vmatprep.mubr.bf16.mxu1 %v1572_v20 }
 0x24d   : > { %v2872_v32 = vpop.eup %2871 }
 0x24e   : > { %v1556_v62 = vmul.f32 %v2872_v32, %v3749_v55 }
 0x24f   : > { %v2874_v59 = vpop.eup %2873 }
 0x250   : > { %v1557_v60 = vmul.f32 %v2874_v59, %v3758_v48 }
 0x252   : > { %v1573_v0 = vpack.c.bf16 %v1557_v60, %v1556_v62 }
 0x254   : > { %2550 = vmatmul.mubr.bf16.gmra.mrb[60].mxu1 %v1573_v0 }
 0x255   : > { %3032 = shalt.err (!%p3029_p3)
}
 0x256   : > { %s3033_s17 = scalar_lea.hbm %s3825_s28, 4096  ;;  %s3037_s29 = scalar_lea.hbm %s4029_s9, 8192 }
 0x257   : > { %p3034_p9 = scmp.ne.s32.totalorder %s3825_s28, %s3033_s17  ;;  %p3038_p7 = scmp.lt.u32.totalorder %s3825_s28, %s4029_s9 }
 0x258   : > { %p3039_p12 = scmp.lt.u32.totalorder %s3037_s29, %s3033_s17  ;;  %p3041_p2 = scmp.lt.u32.totalorder %s3033_s17, %s3825_s28 }
 0x259   : > { %p3035_p13 = pnand %p3034_p9, %p3384_p5 }
 0x25a   : > { %p3040_p1 = por %p3039_p12, %p3038_p7 }
 0x25b   : > { %p3036_p11 = pneg %p3035_p13 }
 0x25c   : > { %p3042_p4 = por %p3041_p2, %p3040_p1 }
 0x25e   : > { %p3043_p0 = pnand %p3042_p4, %p3036_p11 }
 0x260   : > { %3046 = shalt.err (!%p3043_p0)
}
 0x261   : > { %s3169_s24 = smov 128   ;;  %s3170_s23 = smov 8  }
 0x262   : > { %2570 = dma.vmem_to_hbm [thread:$0]  (%p3384_p5), %s3827_s25, 4096, %s3825_s28, %s3831_s7, %s3169_s24, %s3169_s24, %s3170_s23  }
 0x263   : > { %s3862_s4 = scalar_lea.hbm %s4028_s8, %s3818_s10  ;;  %s1926_s21 = sshll.u32 %s3560_s0, 4  ;;  %s3865_s21 = int_to_ptr.vmem [resolvable:$true] %s1926_s21 }
 0x264   : > { %s1903_s27 = scalar_lea.sflag [#allocation4], %s3474_s22  ;;  %s3047_s17 = scalar_lea.vmem %s3865_s21, 4096 }
 0x265   : > { %p3048_p8 = scmp.ne.s32.totalorder %s3865_s21, %s3047_s17  ;;  %s3171_s2 = smov [#allocation11]  }
 0x266   : > { %s3051_s19 = sshll.u32 %s3171_s2, 4  ;;  %s3052_s19 = int_to_ptr.vmem [resolvable:$false] %s3051_s19 }
 0x267   : > { %p3049_p6 = pnand %p3048_p8, %p3384_p5  ;;  %s3053_s25 = scalar_lea.vmem %s3052_s19, 8192 }
 0x268   : > { %p3054_p3 = scmp.lt.s32.totalorder %s3865_s21, %s3052_s19  ;;  %p3055_p9 = scmp.lt.s32.totalorder %s3053_s25, %s3047_s17 }
 0x269   : > { %p3050_p10 = pneg %p3049_p6 }
 0x26a   : > { %p3056_p13 = por %p3055_p9, %p3054_p3 }
 0x26c   : > { %p3057_p11 = pnand %p3056_p13, %p3050_p10 }
 0x26e   : > { %3060 = shalt.err (!%p3057_p11)
}
 0x26f   : > { %s3061_s0 = scalar_lea.hbm %s3862_s4, 4096  ;;  %s3065_s11 = scalar_lea.hbm %s4028_s8, 8192 }
 0x270   : > { %p3062_p7 = scmp.ne.s32.totalorder %s3862_s4, %s3061_s0  ;;  %p3066_p2 = scmp.lt.u32.totalorder %s3862_s4, %s4028_s8 }
 0x271   : > { %p3067_p4 = scmp.lt.u32.totalorder %s3065_s11, %s3061_s0  ;;  %p3069_p8 = scmp.lt.u32.totalorder %s3061_s0, %s3862_s4 }
 0x272   : > { %p3063_p12 = pnand %p3062_p7, %p3384_p5 }
 0x273   : > { %p3068_p0 = por %p3067_p4, %p3066_p2 }
 0x274   : > { %p3064_p1 = pneg %p3063_p12 }
 0x275   : > { %p3070_p6 = por %p3069_p8, %p3068_p0 }
 0x277   : > { %p3071_p10 = pnand %p3070_p6, %p3064_p1 }
 0x279   : > { %3074 = shalt.err (!%p3071_p10)
}
 0x27a   : > { %2569 = dma.vmem_to_hbm [thread:$0]  (%p3384_p5), %s3865_s21, 4096, %s3862_s4, %s1903_s27, %s3169_s24, %s3169_s24, %s3170_s23  }
 0x27b   : > { %s4068_s2 = sld [smem:[#allocation27_spill]]  ;;  %s3902_s19 = scalar_lea.vmem [#allocation14], %s3477_s30 }
 0x27c   : > { %s1958_s22 = sshll.u32 %s3902_s19, 4  ;;  %s4069_s21 = sld [smem:[#allocation28_spill]]  ;;  %s3971_s22 = int_to_ptr.vmem [resolvable:$true] %s1958_s22 }
 0x27d   : > { %s3075_s25 = scalar_lea.vmem %s3971_s22, 4096  ;;  %s3172_s0 = smov [#allocation14]  }
 0x27e   : > { %p3076_p3 = scmp.ne.s32.totalorder %s3971_s22, %s3075_s25  ;;  %s3079_s28 = sshll.u32 %s3172_s0, 4  ;;  %s3080_s28 = int_to_ptr.vmem [resolvable:$false] %s3079_s28 }
 0x27f   : > { %s3081_s29 = scalar_lea.vmem %s3080_s28, 8192  ;;  %p3082_p11 = scmp.lt.s32.totalorder %s3971_s22, %s3080_s28 }
 0x280   : > { %p3077_p9 = pnand %p3076_p3, %p3384_p5  ;;  %p3083_p7 = scmp.lt.s32.totalorder %s3081_s29, %s3075_s25 }
 0x281   : > { %v3897_v55 = vld [vmem:[%s4068_s2] ss:$0 sm:$0xff] }
 0x282   : > { %s3969_s27 = scalar_lea.hbm %s4069_s21, %s3818_s10  ;;  %p3078_p13 = pneg %p3077_p9 }
 0x283   : > { %p3084_p12 = por %p3083_p7, %p3082_p11 }
 0x285   : > { %p3085_p1 = pnand %p3084_p12, %p3078_p13 }
 0x2b7   : > { %v2523_v40 = vpop.f32.mrb[32].mxu1 }
 0x2b8   : > { %v1688_v48 = vadd.f32 %v2523_v40, %v3897_v55  ;;  %v1679_v9 = vpop.f32.mrb[33].mxu1 }
 0x2b9   : > { %v1680_v23 = vadd.f32 %v3897_v55, %v1679_v9  ;;  %v2524_v53 = vpop.f32.mrb[34].mxu1 }
 0x2ba   : > { %1872 = vst [vmem:[%s3902_s19 + $0x10] sm:$0xff] %v1688_v48  ;;  %v1691_v2 = vadd.f32 %v2524_v53, %v3897_v55  ;;  %v1682_v3 = vpop.f32.mrb[35].mxu1 }
 0x2bb   : > { %1870 = vst [vmem:[%s3902_s19] sm:$0xff] %v1680_v23  ;;  %v1683_v6 = vadd.f32 %v3897_v55, %v1682_v3 }
 0x2bc   : > { %1873 = vst [vmem:[%s3902_s19 + $0x18] sm:$0xff] %v1691_v2 }
 0x2bd   : > { %1871 = vst [vmem:[%s3902_s19 + $0x8] sm:$0xff] %v1683_v6 }
 0x2c7   : > { %v2527_v7 = vpop.f32.mrb[36].mxu1 }
 0x2c8   : > { %v1704_v8 = vadd.f32 %v2527_v7, %v3897_v55  ;;  %v1695_v63 = vpop.f32.mrb[37].mxu1 }
 0x2c9   : > { %v1696_v11 = vadd.f32 %v3897_v55, %v1695_v63  ;;  %v2528_v56 = vpop.f32.mrb[38].mxu1 }
 0x2ca   : > { %1876 = vst [vmem:[%s3902_s19 + $0x30] sm:$0xff] %v1704_v8  ;;  %v1707_v33 = vadd.f32 %v2528_v56, %v3897_v55  ;;  %v1698_v12 = vpop.f32.mrb[39].mxu1 }
 0x2cb   : > { %1874 = vst [vmem:[%s3902_s19 + $0x20] sm:$0xff] %v1696_v11  ;;  %v1699_v13 = vadd.f32 %v3897_v55, %v1698_v12 }
 0x2cc   : > { %1877 = vst [vmem:[%s3902_s19 + $0x38] sm:$0xff] %v1707_v33 }
 0x2cd   : > { %1875 = vst [vmem:[%s3902_s19 + $0x28] sm:$0xff] %v1699_v13 }
 0x2d7   : > { %v2531_v5 = vpop.f32.mrb[40].mxu1 }
 0x2d8   : > { %v1720_v14 = vadd.f32 %v2531_v5, %v3897_v55  ;;  %v1711_v15 = vpop.f32.mrb[41].mxu1 }
 0x2d9   : > { %v1712_v16 = vadd.f32 %v3897_v55, %v1711_v15  ;;  %v2532_v18 = vpop.f32.mrb[42].mxu1 }
 0x2da   : > { %1880 = vst [vmem:[%s3902_s19 + $0x50] sm:$0xff] %v1720_v14  ;;  %v1723_v36 = vadd.f32 %v2532_v18, %v3897_v55  ;;  %v1714_v21 = vpop.f32.mrb[43].mxu1 }
 0x2db   : > { %1878 = vst [vmem:[%s3902_s19 + $0x40] sm:$0xff] %v1712_v16  ;;  %v1715_v22 = vadd.f32 %v3897_v55, %v1714_v21 }
 0x2dc   : > { %1881 = vst [vmem:[%s3902_s19 + $0x58] sm:$0xff] %v1723_v36 }
 0x2dd   : > { %1879 = vst [vmem:[%s3902_s19 + $0x48] sm:$0xff] %v1715_v22 }
 0x2e7   : > { %v2535_v25 = vpop.f32.mrb[44].mxu1 }
 0x2e8   : > { %v1736_v28 = vadd.f32 %v2535_v25, %v3897_v55  ;;  %v1727_v29 = vpop.f32.mrb[45].mxu1 }
 0x2e9   : > { %v1728_v24 = vadd.f32 %v3897_v55, %v1727_v29  ;;  %v2536_v1 = vpop.f32.mrb[46].mxu1 }
 0x2ea   : > { %1884 = vst [vmem:[%s3902_s19 + $0x70] sm:$0xff] %v1736_v28  ;;  %v1739_v51 = vadd.f32 %v2536_v1, %v3897_v55  ;;  %v1730_v31 = vpop.f32.mrb[47].mxu1 }
 0x2eb   : > { %1882 = vst [vmem:[%s3902_s19 + $0x60] sm:$0xff] %v1728_v24  ;;  %v1731_v27 = vadd.f32 %v3897_v55, %v1730_v31 }
 0x2ec   : > { %1885 = vst [vmem:[%s3902_s19 + $0x78] sm:$0xff] %v1739_v51 }
 0x2ed   : > { %1883 = vst [vmem:[%s3902_s19 + $0x68] sm:$0xff] %v1731_v27 }
 0x2f7   : > { %v2539_v35 = vpop.f32.mrb[48].mxu1 }
 0x2f8   : > { %v1752_v34 = vadd.f32 %v2539_v35, %v3897_v55  ;;  %v1743_v37 = vpop.f32.mrb[49].mxu1 }
 0x2f9   : > { %v1744_v61 = vadd.f32 %v3897_v55, %v1743_v37  ;;  %v2540_v10 = vpop.f32.mrb[50].mxu1 }
 0x2fa   : > { %1888 = vst [vmem:[%s3902_s19 + $0x90] sm:$0xff] %v1752_v34  ;;  %v1755_v41 = vadd.f32 %v2540_v10, %v3897_v55  ;;  %v1746_v38 = vpop.f32.mrb[51].mxu1 }
 0x2fb   : > { %1886 = vst [vmem:[%s3902_s19 + $0x80] sm:$0xff] %v1744_v61  ;;  %v1747_v42 = vadd.f32 %v3897_v55, %v1746_v38 }
 0x2fc   : > { %1889 = vst [vmem:[%s3902_s19 + $0x98] sm:$0xff] %v1755_v41 }
 0x2fd   : > { %1887 = vst [vmem:[%s3902_s19 + $0x88] sm:$0xff] %v1747_v42 }
 0x307   : > { %v2543_v57 = vpop.f32.mrb[52].mxu1 }
 0x308   : > { %v1768_v43 = vadd.f32 %v2543_v57, %v3897_v55  ;;  %v1759_v44 = vpop.f32.mrb[53].mxu1 }
 0x309   : > { %v1760_v45 = vadd.f32 %v3897_v55, %v1759_v44  ;;  %v2544_v17 = vpop.f32.mrb[54].mxu1 }
 0x30a   : > { %1892 = vst [vmem:[%s3902_s19 + $0xb0] sm:$0xff] %v1768_v43  ;;  %v1771_v4 = vadd.f32 %v2544_v17, %v3897_v55  ;;  %v1762_v46 = vpop.f32.mrb[55].mxu1 }
 0x30b   : > { %1890 = vst [vmem:[%s3902_s19 + $0xa0] sm:$0xff] %v1760_v45  ;;  %v1763_v19 = vadd.f32 %v3897_v55, %v1762_v46 }
 0x30c   : > { %1893 = vst [vmem:[%s3902_s19 + $0xb8] sm:$0xff] %v1771_v4 }
 0x30d   : > { %1891 = vst [vmem:[%s3902_s19 + $0xa8] sm:$0xff] %v1763_v19 }
 0x317   : > { %v2547_v47 = vpop.f32.mrb[56].mxu1 }
 0x318   : > { %v1784_v26 = vadd.f32 %v2547_v47, %v3897_v55  ;;  %v1775_v49 = vpop.f32.mrb[57].mxu1 }
 0x319   : > { %v1776_v50 = vadd.f32 %v3897_v55, %v1775_v49  ;;  %v2548_v39 = vpop.f32.mrb[58].mxu1 }
 0x31a   : > { %1896 = vst [vmem:[%s3902_s19 + $0xd0] sm:$0xff] %v1784_v26  ;;  %v1787_v52 = vadd.f32 %v2548_v39, %v3897_v55  ;;  %v1778_v54 = vpop.f32.mrb[59].mxu1 }
 0x31b   : > { %1894 = vst [vmem:[%s3902_s19 + $0xc0] sm:$0xff] %v1776_v50  ;;  %v1779_v30 = vadd.f32 %v3897_v55, %v1778_v54 }
 0x31c   : > { %1897 = vst [vmem:[%s3902_s19 + $0xd8] sm:$0xff] %v1787_v52 }
 0x31d   : > { %1895 = vst [vmem:[%s3902_s19 + $0xc8] sm:$0xff] %v1779_v30 }
 0x327   : > { %v2551_v58 = vpop.f32.mrb[60].mxu1 }
 0x328   : > { %v1800_v20 = vadd.f32 %v2551_v58, %v3897_v55  ;;  %v1791_v32 = vpop.f32.mrb[61].mxu1 }
 0x329   : > { %v1792_v59 = vadd.f32 %v3897_v55, %v1791_v32  ;;  %v2552_v62 = vpop.f32.mrb[62].mxu1 }
 0x32a   : > { %1900 = vst [vmem:[%s3902_s19 + $0xf0] sm:$0xff] %v1800_v20  ;;  %v1803_v60 = vadd.f32 %v2552_v62, %v3897_v55  ;;  %v1794_v0 = vpop.f32.mrb[63].mxu1 }
 0x32b   : > { %1898 = vst [vmem:[%s3902_s19 + $0xe0] sm:$0xff] %v1792_v59  ;;  %v1795_v40 = vadd.f32 %v3897_v55, %v1794_v0 }
 0x32c   : > { %1901 = vst [vmem:[%s3902_s19 + $0xf8] sm:$0xff] %v1803_v60 }
 0x32d   : > { %1899 = vst [vmem:[%s3902_s19 + $0xe8] sm:$0xff] %v1795_v40 }
 0x32e   : > { %3088 = shalt.err (!%p3085_p1)
}
 0x32f   : > { %s3089_s10 = scalar_lea.hbm %s3969_s27, 4096  ;;  %s3093_s6 = scalar_lea.hbm %s4069_s21, 8192 }
 0x330   : > { %p3090_p2 = scmp.ne.s32.totalorder %s3969_s27, %s3089_s10  ;;  %p3094_p8 = scmp.lt.u32.totalorder %s3969_s27, %s4069_s21 }
 0x331   : > { %p3095_p6 = scmp.lt.u32.totalorder %s3093_s6, %s3089_s10  ;;  %p3097_p3 = scmp.lt.u32.totalorder %s3089_s10, %s3969_s27 }
 0x332   : > { %p3091_p4 = pnand %p3090_p2, %p3384_p5 }
 0x333   : > { %p3096_p10 = por %p3095_p6, %p3094_p8 }
 0x334   : > { %p3092_p0 = pneg %p3091_p4 }
 0x335   : > { %p3098_p9 = por %p3097_p3, %p3096_p10 }
 0x337   : > { %p3099_p13 = pnand %p3098_p9, %p3092_p0 }
 0x339   : > { %3102 = shalt.err (!%p3099_p13)
}
 0x33a   : > { %2571 = dma.vmem_to_hbm [thread:$0]  (%p3384_p5), %s3971_s22, 4096, %s3969_s27, %s3831_s7, %s3169_s24, %s3169_s24, %s3170_s23  }
 0x33b PF: > { %s4070_s2 = sld [smem:[#allocation21_spill]]  ;;  %s4071_s19 = sld [smem:[#allocation22_spill]] }
 0x33c   : > { %p4073_p7 = scmp.ge.s32.totalorder %s3157_s16, 2 }
 0x341   : > { %s1973_s30 = sand.u32 1, %s4070_s2   ;;  %p4072_p11 = scmp.ne.s32.totalorder %s4071_s19, 0 }
 0x342   : > { %s1974_s4 = scalar_lea.sflag [#allocation4], %s1973_s30 }
 0x343   : > { %p2593_p12 = pnand %p4073_p7, %p4072_p11 }
 0x345   : > { %3136 = dma.done.wait (!%p2593_p12), %s1974_s4, 4096  }
 0x346   : > { %3138 = vsyncadd (!%p2593_p12), %s1974_s4, 4294963200  ;;  %s4074_s20 = sadd.s32 4294967294, %s3157_s16  }
 0x347   : > { %s1982_s25 = sand.u32 1, %s4074_s20  }
 0x348   : > { %s1983_s0 = scalar_lea.sflag [#allocation13], %s1982_s25 }
 0x349   : > { %3140 = dma.done.wait (!%p2593_p12), %s1983_s0, 8192  }
 0x34a   : > { %3142 = vsyncadd (!%p2593_p12), %s1983_s0, 4294959104  ;;  %s4075_s7 = smov %s3380_s13  ;;  %p31_p5 = scmp.ge.s32.totalorder %s3370_s18, 4  }
 0x34b   : > { %s4076_s13 = smov %s3149_s14  ;;  %s4077_s14 = smov %s3153_s15 }
 0x34c   : > { %s4078_s15 = smov %s4075_s7  ;;  %s4079_s16 = smov %s3370_s18 }
 0x34d   :  { %33 = sbr.rel (!%p31_p5) target bundleno = 17 (0x11), region = 154 }
 0x354   :  { %1997 = vsyncpa [#allocation3], 1 }
 0x355   :  { %1999 = vsyncpa [#allocation3 + $0x1], 1 }
 0x356   :  { %2000 = vsyncpa [#allocation6], 1 }
 0x357   :  { %2002 = vsyncpa [#allocation6 + $0x1], 1 }
 0x358   :  { %2003 = vsyncpa [#allocation9], 1 }
 0x359   :  { %2004 = vsyncpa [#allocation4], 1 }
 0x35a   :  { %2006 = vsyncpa [#allocation4 + $0x1], 1 }
 0x35b   :  { %2007 = vsyncpa [#allocation13], 1 }
 0x35c   :  { %2009 = vsyncpa [#allocation13 + $0x1], 1 }

</bundles_post_ra>
